<compile_context>
chip_gen: v5e
topology: v5e:2x2
jax: 0.10.0
libtpu: 0.0.40
codegen_flags: <defaults>
</compile_context>

<pallas_src>
import numpy as np
import jax
import jax.numpy as jnp
from jax import lax
from jax.experimental import pallas as pl
from jax.experimental.pallas import tpu as pltpu


# ----------------------------------------------------------------------------
# Pallas kernel: one grid step == one (batch block, chunk of Tc timesteps).
# Time (inner grid axis) is serial; batch (outer grid axis) is parallel.
# ----------------------------------------------------------------------------
def _lstm_recurrence_kernel(mask_ref,   # (Tc, Bt, 1)  f32   1.0 = valid step
                            gx_ref,     # (Tc, Bt, 4H) bf16  x @ W_ih^T (no bias)
                            bias_ref,   # (1, 4H)      f32   b_ih + b_hh
                            whh_ref,    # (H, 4H)      bf16  W_hh^T
                            h0_ref,     # (Bt, H)      f32
                            c0_ref,     # (Bt, H)      f32
                            hseq_ref,   # (Tc, Bt, H)  bf16  masked LSTM outputs
                            hn_ref,     # (Bt, H)      f32   carry / final h
                            cn_ref):    # (Bt, H)      f32   carry / final c
    chunk = pl.program_id(1)            # time axis is the inner (serial) axis
    tc = gx_ref.shape[0]
    hdim = h0_ref.shape[-1]

    # hn/cn output blocks keep the same block index across the time axis, so
    # they stay VMEM-resident: use them directly as the recurrent carry.
    # HBM writeback only happens when the batch block finishes.
    @pl.when(chunk == 0)
    def _():
        hn_ref[...] = h0_ref[...]
        cn_ref[...] = c0_ref[...]

    whh = whh_ref[...]                  # VMEM/vreg resident for the whole chunk
    bias = bias_ref[...]                # f32 bias added in-kernel (gx is bf16)

    def sig(x):                         # sigmoid via tanh: one EUP op per gate
        return 0.5 * jnp.tanh(0.5 * x) + 0.5

    def step(s, carry):
        h_prev, c_prev = carry
        # gates = gates_x[t] + bias + h_{t-1} @ W_hh^T  (bf16 MXU, f32 accum)
        gates = (gx_ref[s].astype(jnp.float32) + bias
                 + jnp.dot(h_prev.astype(whh.dtype), whh,
                           preferred_element_type=jnp.float32))
        # PyTorch LSTM gate order: i, f, g, o.
        # NOTE: for production use keep H a multiple of 128 (lane-aligned
        # slices) and B a multiple of 8 (full sublanes).
        i_g = sig(gates[:, 0 * hdim:1 * hdim])
        f_g = sig(gates[:, 1 * hdim:2 * hdim])
        g_g = jnp.tanh(gates[:, 2 * hdim:3 * hdim])
        o_g = sig(gates[:, 3 * hdim:4 * hdim])
        c_new = f_g * c_prev + i_g * g_g
        h_new = o_g * jnp.tanh(c_new)
        # packed-sequence masking via the precomputed 0/1 mask (pure VALU work;
        # no per-step integer compare on the serial critical path).
        m = mask_ref[s]                                  # (Bt, 1) f32
        h_next = h_prev + m * (h_new - h_prev)
        c_next = c_prev + m * (c_new - c_prev)
        hseq_ref[s] = (m * h_new).astype(hseq_ref.dtype)
        return h_next, c_next

    # NOTE: at production (B, H) check the bundle dump for vreg spills and
    # drop to unroll=2/4 (or a smaller time_chunk) if they appear.
    h_fin, c_fin = lax.fori_loop(0, tc, step, (hn_ref[...], cn_ref[...]),
                                 unroll=True)
    hn_ref[...] = h_fin
    cn_ref[...] = c_fin


# ----------------------------------------------------------------------------
# Wrapper: embedding gather + hoisted bf16 projections (XLA GEMMs) + recurrence.
# ----------------------------------------------------------------------------
def language_model_forward(tokens, input_lengths, hidden, params, *,
                           time_chunk=16,
                           batch_block=None,
                           recurrent_weight_dtype=jnp.bfloat16,
                           stream_dtype=jnp.bfloat16):
    """
    tokens         : (T, B) int32
    input_lengths  : host array / list of ints, length B (CPU lengths, like
                     PyTorch's pack_padded_sequence)
    hidden         : (h0, c0), each (num_layers=1, B, H) float32
    returns (decoded (B, O, T_max), (h_n, c_n) each (1, B, H))
    """
    emb = params["embedding"]          # (V, E)
    w_ih = params["w_ih"]              # (4H, E)
    w_hh = params["w_hh"]              # (4H, H)
    b_ih = params["b_ih"]              # (4H,)
    b_hh = params["b_hh"]              # (4H,)
    w_out = params["w_out"]            # (O, H)
    b_out = params["b_out"]            # (O,)

    T, B = tokens.shape
    E = emb.shape[1]
    H = w_hh.shape[1]
    O = w_out.shape[0]

    lens_np = np.asarray(input_lengths).astype(np.int32)      # host lengths
    t_max = int(lens_np.max())                                 # pad_packed trunc
    tc = max(1, min(int(time_chunk), t_max))
    num_chunks = -(-t_max // tc)
    t_pad = num_chunks * tc

    # batch blocking: outer "parallel" grid axis (2 TensorCores on v7x).
    bt = B if batch_block is None else int(batch_block)
    assert B % bt == 0, "batch_block must divide B"
    num_bblocks = B // bt

    # --- glue: embedding gather (plain JAX) only over live timesteps ---------
    feats = jnp.take(emb, tokens[:t_max], axis=0)              # (t_max, B, E)

    # --- hoisted input projection: ONE bf16 MXU GEMM, f32 accumulate ---------
    gx = jnp.dot(feats.reshape(t_max * B, E).astype(jnp.bfloat16),
                 w_ih.T.astype(jnp.bfloat16),
                 preferred_element_type=jnp.float32)
    gx = gx.astype(stream_dtype).reshape(t_max, B, 4 * H)      # stream as bf16
    if t_pad > t_max:                                          # pad time axis
        gx = jnp.pad(gx, ((0, t_pad - t_max), (0, 0), (0, 0)))

    # --- pack_padded_sequence mask: precomputed once, streamed per chunk -----
    mask = (np.arange(t_pad, dtype=np.int32)[:, None]
            < lens_np[None, :]).astype(np.float32)             # (t_pad, B)
    mask = jnp.asarray(mask)[:, :, None]                       # (t_pad, B, 1)

    bias = (b_ih + b_hh).astype(jnp.float32).reshape(1, 4 * H)
    whh_t = jnp.asarray(w_hh).T.astype(recurrent_weight_dtype)  # (H, 4H)
    h0 = hidden[0][0].astype(jnp.float32)                       # (B, H)
    c0 = hidden[1][0].astype(jnp.float32)                       # (B, H)

    # --- explicit VMEM budget (double-buffered streams + resident constants) -
    s_item = jnp.dtype(stream_dtype).itemsize
    r_item = jnp.dtype(recurrent_weight_dtype).itemsize
    blk_bytes = (tc * bt * 4 * H * s_item          # gx chunk
                 + tc * bt * H * s_item            # hseq chunk
                 + tc * bt * 4                     # mask chunk
                 + H * 4 * H * r_item              # W_hh^T
                 + 4 * bt * H * 4 + 4 * H * 4)     # h0, c0, hn, cn, bias
    vmem_limit = int(min(max(2 * blk_bytes + (4 << 20), 16 << 20), 64 << 20))

    out_shapes = (
        jax.ShapeDtypeStruct((t_pad, B, H), stream_dtype),  # masked LSTM outputs
        jax.ShapeDtypeStruct((B, H), jnp.float32),          # h_n
        jax.ShapeDtypeStruct((B, H), jnp.float32),          # c_n
    )

    # NOTE: whh/bias/h0/c0 use constant index maps; Pallas still double-buffers
    # them by default (single-buffering via pipeline_mode is left as a tuning
    # knob for very large H where the redundant W_hh buffer matters).
    grid_spec = pltpu.PrefetchScalarGridSpec(
        num_scalar_prefetch=0,
        grid=(num_bblocks, num_chunks),           # (batch parallel, time serial)
        in_specs=[
            pl.BlockSpec((tc, bt, 1), lambda bb, c: (c, bb, 0)),      # mask
            pl.BlockSpec((tc, bt, 4 * H), lambda bb, c: (c, bb, 0)),  # gx chunk
            pl.BlockSpec((1, 4 * H), lambda bb, c: (0, 0)),           # bias
            pl.BlockSpec((H, 4 * H), lambda bb, c: (0, 0)),           # W_hh^T
            pl.BlockSpec((bt, H), lambda bb, c: (bb, 0)),             # h0
            pl.BlockSpec((bt, H), lambda bb, c: (bb, 0)),             # c0
        ],
        out_specs=[
            pl.BlockSpec((tc, bt, H), lambda bb, c: (c, bb, 0)),      # h sequence
            pl.BlockSpec((bt, H), lambda bb, c: (bb, 0)),             # h_n
            pl.BlockSpec((bt, H), lambda bb, c: (bb, 0)),             # c_n
        ],
    )

    h_seq, h_n, c_n = pl.pallas_call(
        _lstm_recurrence_kernel,
        out_shape=out_shapes,
        grid_spec=grid_spec,
        compiler_params=pltpu.CompilerParams(
            dimension_semantics=("parallel", "arbitrary"),
            vmem_limit_bytes=vmem_limit),
    )(mask, gx, bias, whh_t, h0, c0)

    # --- hoisted output projection: ONE bf16 MXU GEMM (h_seq already bf16) ---
    dec = jnp.dot(h_seq[:t_max].reshape(t_max * B, H),
                  w_out.T.astype(jnp.bfloat16),
                  preferred_element_type=jnp.float32)
    dec = (dec + b_out.astype(jnp.float32)).reshape(t_max, B, O)
    decoded = jnp.transpose(dec, (1, 2, 0))                   # (B, O, T_max)
    return decoded, (h_n[None], c_n[None])


# ----------------------------------------------------------------------------
# Pure-JAX reference (mirrors the bf16 gx / W_hh / h_seq casts of the kernel).
# ----------------------------------------------------------------------------
def _reference_forward(tokens, input_lengths, hidden, params,
                       recurrent_weight_dtype=jnp.bfloat16,
                       stream_dtype=jnp.bfloat16):
    emb, w_ih, w_hh = params["embedding"], params["w_ih"], params["w_hh"]
    b_ih, b_hh = params["b_ih"], params["b_hh"]
    w_out, b_out = params["w_out"], params["b_out"]
    T, B = tokens.shape
    E = emb.shape[1]
    H = w_hh.shape[1]
    O = w_out.shape[0]

    feats = jnp.take(emb, tokens, axis=0)                     # (T, B, E)
    gx = jnp.dot(feats.reshape(T * B, E).astype(jnp.bfloat16),
                 w_ih.T.astype(jnp.bfloat16),
                 preferred_element_type=jnp.float32).astype(stream_dtype)
    gx = gx.reshape(T, B, 4 * H)
    bias = (b_ih + b_hh).astype(jnp.float32)
    lens = jnp.asarray(np.asarray(input_lengths), jnp.int32)
    whh_rec = jnp.asarray(w_hh).T.astype(recurrent_weight_dtype)
    h = hidden[0][0].astype(jnp.float32)
    c = hidden[1][0].astype(jnp.float32)

    def sig(x):
        return 0.5 * jnp.tanh(0.5 * x) + 0.5

    def step(carry, inp):
        h, c = carry
        gx_t, t = inp
        gates = (gx_t.astype(jnp.float32) + bias
                 + jnp.dot(h.astype(whh_rec.dtype), whh_rec,
                           preferred_element_type=jnp.float32))
        i = sig(gates[:, 0 * H:1 * H])
        f = sig(gates[:, 1 * H:2 * H])
        g = jnp.tanh(gates[:, 2 * H:3 * H])
        o = sig(gates[:, 3 * H:4 * H])
        c_new = f * c + i * g
        h_new = o * jnp.tanh(c_new)
        m = (t < lens)[:, None].astype(jnp.float32)
        h_u = h + m * (h_new - h)
        c_u = c + m * (c_new - c)
        y = (m * h_new).astype(stream_dtype)
        return (h_u, c_u), y

    (h_n, c_n), ys = lax.scan(step, (h, c), (gx, jnp.arange(T)))
    dec = (jnp.dot(ys.reshape(T * B, H), w_out.T.astype(jnp.bfloat16),
                   preferred_element_type=jnp.float32)
           + b_out.astype(jnp.float32)).reshape(T, B, O)
    t_max = int(np.max(np.asarray(input_lengths)))
    return jnp.transpose(dec[:t_max], (1, 2, 0)), (h_n[None], c_n[None])


# ----------------------------------------------------------------------------
if __name__ == "__main__":
    # small shapes consistent with the module's forward:
    #   input (T, B), hidden (num_layers, B, H)
    T, B = 14, 2
    V, E = 20, 32          # vocab size, embedding dim (input_size)
    H, O = 32, 16          # hidden_size, output_size
    num_layers = 1

    key = jax.random.PRNGKey(0)
    ks = jax.random.split(key, 8)
    params = {
        "embedding": jax.random.normal(ks[0], (V, E), jnp.float32) * 0.5,
        "w_ih": jax.random.normal(ks[1], (4 * H, E), jnp.float32) * 0.1,
        "w_hh": jax.random.normal(ks[2], (4 * H, H), jnp.float32) * 0.1,
        "b_ih": jax.random.normal(ks[3], (4 * H,), jnp.float32) * 0.1,
        "b_hh": jax.random.normal(ks[4], (4 * H,), jnp.float32) * 0.1,
        "w_out": jax.random.normal(ks[5], (O, H), jnp.float32) * 0.1,
        "b_out": jax.random.normal(ks[6], (O,), jnp.float32) * 0.1,
    }

    tokens = jax.random.randint(ks[7], (T, B), 0, V, dtype=jnp.int32)
    input_lengths = np.array([12, 9], dtype=np.int64)   # sorted descending, < T
    h0 = jnp.zeros((num_layers, B, H), jnp.float32)
    c0 = jnp.zeros((num_layers, B, H), jnp.float32)

    # time_chunk=8 exercises the multi-chunk + time-padding path at this size;
    # production default is 16 (sweep 16-32 against the VMEM budget).
    decoded, (h_n, c_n) = language_model_forward(
        tokens, input_lengths, (h0, c0), params, time_chunk=8)
    decoded = jax.block_until_ready(decoded)
    h_n = jax.block_until_ready(h_n)
    c_n = jax.block_until_ready(c_n)

    # verify against pure-JAX reference (same bf16 casts)
    dec_ref, (h_ref, c_ref) = _reference_forward(
        tokens, input_lengths, (h0, c0), params)
    t_max = int(np.max(input_lengths))
    assert decoded.shape == (B, O, t_max)
    assert h_n.shape == (num_layers, B, H) and c_n.shape == (num_layers, B, H)
    np.testing.assert_allclose(np.asarray(decoded), np.asarray(dec_ref),
                               rtol=2e-3, atol=2e-3)
    np.testing.assert_allclose(np.asarray(h_n), np.asarray(h_ref),
                               rtol=2e-3, atol=2e-3)
    np.testing.assert_allclose(np.asarray(c_n), np.asarray(c_ref),
                               rtol=2e-3, atol=2e-3)

    print("KERNEL_OK")
</pallas_src>

<mosaic_0001>
module attributes {stable_mosaic.version = 11 : i64} {
  func.func @_lstm_recurrence_kernel(%arg0: i32, %arg1: i32, %arg2: memref<8x2x1xf32, #tpu.memory_space<vmem>>, %arg3: memref<8x2x128xbf16, #tpu.memory_space<vmem>>, %arg4: memref<1x128xf32, #tpu.memory_space<vmem>>, %arg5: memref<32x128xbf16, #tpu.memory_space<vmem>>, %arg6: memref<2x32xf32, #tpu.memory_space<vmem>>, %arg7: memref<2x32xf32, #tpu.memory_space<vmem>>, %arg8: memref<8x2x32xbf16, #tpu.memory_space<vmem>>, %arg9: memref<2x32xf32, #tpu.memory_space<vmem>>, %arg10: memref<2x32xf32, #tpu.memory_space<vmem>>) attributes {dimension_semantics = [#tpu.dimension_semantics<parallel>, #tpu.dimension_semantics<arbitrary>], iteration_bounds = array<i64: 1, 2>, scalar_prefetch = 0 : i64, scratch_operands = 0 : i64, tpu.core_type = #tpu.core_type<tc>, window_params = [{transform_indices = @transform_0, window_bounds = array<i64: 8, 2, 1>}, {transform_indices = @transform_1, window_bounds = array<i64: 8, 2, 128>}, {pipeline_mode = #tpu.pipeline_mode<synchronous>, transform_indices = @transform_2, window_bounds = array<i64: 1, 128>}, {pipeline_mode = #tpu.pipeline_mode<synchronous>, transform_indices = @transform_3, window_bounds = array<i64: 32, 128>}, {transform_indices = @transform_4, window_bounds = array<i64: 2, 32>}, {transform_indices = @transform_5, window_bounds = array<i64: 2, 32>}, {transform_indices = @transform_6, window_bounds = array<i64: 8, 2, 32>}, {transform_indices = @transform_7, window_bounds = array<i64: 2, 32>}, {transform_indices = @transform_8, window_bounds = array<i64: 2, 32>}]} {
    %c0_i32 = arith.constant 0 : i32
    %0 = arith.cmpi eq, %arg1, %c0_i32 : i32
    %1 = arith.extui %0 : i1 to i32
    %c0_i32_0 = arith.constant 0 : i32
    %2 = arith.cmpi ne, %1, %c0_i32_0 : i32
    scf.if %2 {
      %c0_140 = arith.constant 0 : index
      %c0_141 = arith.constant 0 : index
      %473 = vector.load %arg6[%c0_140, %c0_141] : memref<2x32xf32, #tpu.memory_space<vmem>>, vector<2x32xf32>
      %c0_142 = arith.constant 0 : index
      %c0_143 = arith.constant 0 : index
      %474 = vector.load %arg9[%c0_142, %c0_143] : memref<2x32xf32, #tpu.memory_space<vmem>>, vector<2x32xf32>
      tpu.vector_store %arg9[%c0_142, %c0_143], %473 {strides = array<i32>} : memref<2x32xf32, #tpu.memory_space<vmem>>, vector<2x32xf32>,
      %c0_144 = arith.constant 0 : index
      %c0_145 = arith.constant 0 : index
      %475 = vector.load %arg7[%c0_144, %c0_145] : memref<2x32xf32, #tpu.memory_space<vmem>>, vector<2x32xf32>
      %c0_146 = arith.constant 0 : index
      %c0_147 = arith.constant 0 : index
      %476 = vector.load %arg10[%c0_146, %c0_147] : memref<2x32xf32, #tpu.memory_space<vmem>>, vector<2x32xf32>
      tpu.vector_store %arg10[%c0_146, %c0_147], %475 {strides = array<i32>} : memref<2x32xf32, #tpu.memory_space<vmem>>, vector<2x32xf32>,
    } else {
    }
    %c0 = arith.constant 0 : index
    %c0_1 = arith.constant 0 : index
    %3 = vector.load %arg5[%c0, %c0_1] : memref<32x128xbf16, #tpu.memory_space<vmem>>, vector<32x128xbf16>
    %c0_2 = arith.constant 0 : index
    %c0_3 = arith.constant 0 : index
    %4 = vector.load %arg4[%c0_2, %c0_3] : memref<1x128xf32, #tpu.memory_space<vmem>>, vector<1x128xf32>
    %c0_4 = arith.constant 0 : index
    %c0_5 = arith.constant 0 : index
    %5 = vector.load %arg9[%c0_4, %c0_5] : memref<2x32xf32, #tpu.memory_space<vmem>>, vector<2x32xf32>
    %c0_6 = arith.constant 0 : index
    %c0_7 = arith.constant 0 : index
    %6 = vector.load %arg10[%c0_6, %c0_7] : memref<2x32xf32, #tpu.memory_space<vmem>>, vector<2x32xf32>
    %c0_i32_8 = arith.constant 0 : i32
    %7 = arith.index_cast %c0_i32_8 : i32 to index
    %c0_9 = arith.constant 0 : index
    %c0_10 = arith.constant 0 : index
    %8 = vector.load %arg3[%7, %c0_9, %c0_10] : memref<8x2x128xbf16, #tpu.memory_space<vmem>>, vector<1x2x128xbf16>
    %9 = vector.shape_cast %8 : vector<1x2x128xbf16> to vector<2x128xbf16>
    %10 = arith.extf %9 : vector<2x128xbf16> to vector<2x128xf32>
    %11 = vector.broadcast %4 : vector<1x128xf32> to vector<2x128xf32>
    %12 = arith.addf %10, %11 : vector<2x128xf32>
    %13 = arith.truncf %5 : vector<2x32xf32> to vector<2x32xbf16>
    %cst = arith.constant dense<0.000000e+00> : vector<2x128xf32>
    %14 = tpu.matmul %13, %3, %cst {dimension_numbers = #tpu.dot_dimension_numbers<[1], [0], [0], [1], [0, 0, 1, 1], [], []>} : vector<2x32xbf16>, vector<32x128xbf16>, vector<2x128xf32> -> vector<2x128xf32>
    %15 = arith.addf %12, %14 : vector<2x128xf32>
    %16 = vector.extract_strided_slice %15 {offsets = [0, 0], sizes = [2, 32], strides = [1, 1]} : vector<2x128xf32> to vector<2x32xf32>
    %cst_11 = arith.constant 5.000000e-01 : f32
    %17 = vector.broadcast %cst_11 : f32 to vector<2x32xf32>
    %18 = arith.mulf %17, %16 : vector<2x32xf32>
    %19 = math.tanh %18 : vector<2x32xf32>
    %cst_12 = arith.constant 5.000000e-01 : f32
    %20 = vector.broadcast %cst_12 : f32 to vector<2x32xf32>
    %21 = arith.mulf %20, %19 : vector<2x32xf32>
    %cst_13 = arith.constant 5.000000e-01 : f32
    %22 = vector.broadcast %cst_13 : f32 to vector<2x32xf32>
    %23 = arith.addf %21, %22 : vector<2x32xf32>
    %24 = vector.extract_strided_slice %15 {offsets = [0, 32], sizes = [2, 32], strides = [1, 1]} : vector<2x128xf32> to vector<2x32xf32>
    %cst_14 = arith.constant 5.000000e-01 : f32
    %25 = vector.broadcast %cst_14 : f32 to vector<2x32xf32>
    %26 = arith.mulf %25, %24 : vector<2x32xf32>
    %27 = math.tanh %26 : vector<2x32xf32>
    %cst_15 = arith.constant 5.000000e-01 : f32
    %28 = vector.broadcast %cst_15 : f32 to vector<2x32xf32>
    %29 = arith.mulf %28, %27 : vector<2x32xf32>
    %cst_16 = arith.constant 5.000000e-01 : f32
    %30 = vector.broadcast %cst_16 : f32 to vector<2x32xf32>
    %31 = arith.addf %29, %30 : vector<2x32xf32>
    %32 = vector.extract_strided_slice %15 {offsets = [0, 64], sizes = [2, 32], strides = [1, 1]} : vector<2x128xf32> to vector<2x32xf32>
    %33 = math.tanh %32 : vector<2x32xf32>
    %34 = vector.extract_strided_slice %15 {offsets = [0, 96], sizes = [2, 32], strides = [1, 1]} : vector<2x128xf32> to vector<2x32xf32>
    %cst_17 = arith.constant 5.000000e-01 : f32
    %35 = vector.broadcast %cst_17 : f32 to vector<2x32xf32>
    %36 = arith.mulf %35, %34 : vector<2x32xf32>
    %37 = math.tanh %36 : vector<2x32xf32>
    %cst_18 = arith.constant 5.000000e-01 : f32
    %38 = vector.broadcast %cst_18 : f32 to vector<2x32xf32>
    %39 = arith.mulf %38, %37 : vector<2x32xf32>
    %cst_19 = arith.constant 5.000000e-01 : f32
    %40 = vector.broadcast %cst_19 : f32 to vector<2x32xf32>
    %41 = arith.addf %39, %40 : vector<2x32xf32>
    %42 = arith.mulf %31, %6 : vector<2x32xf32>
    %43 = arith.mulf %23, %33 : vector<2x32xf32>
    %44 = arith.addf %42, %43 : vector<2x32xf32>
    %45 = math.tanh %44 : vector<2x32xf32>
    %46 = arith.mulf %41, %45 : vector<2x32xf32>
    %47 = arith.index_cast %c0_i32_8 : i32 to index
    %c0_20 = arith.constant 0 : index
    %c0_21 = arith.constant 0 : index
    %48 = vector.load %arg2[%47, %c0_20, %c0_21] : memref<8x2x1xf32, #tpu.memory_space<vmem>>, vector<1x2x1xf32>
    %49 = vector.shape_cast %48 : vector<1x2x1xf32> to vector<2x1xf32>
    %50 = arith.subf %46, %5 : vector<2x32xf32>
    %51 = vector.broadcast %49 : vector<2x1xf32> to vector<2x32xf32>
    %52 = arith.mulf %51, %50 : vector<2x32xf32>
    %53 = arith.addf %5, %52 : vector<2x32xf32>
    %54 = arith.subf %44, %6 : vector<2x32xf32>
    %55 = vector.broadcast %49 : vector<2x1xf32> to vector<2x32xf32>
    %56 = arith.mulf %55, %54 : vector<2x32xf32>
    %57 = arith.addf %6, %56 : vector<2x32xf32>
    %58 = vector.broadcast %49 : vector<2x1xf32> to vector<2x32xf32>
    %59 = arith.mulf %58, %46 : vector<2x32xf32>
    %60 = arith.truncf %59 : vector<2x32xf32> to vector<2x32xbf16>
    %61 = arith.index_cast %c0_i32_8 : i32 to index
    %c0_22 = arith.constant 0 : index
    %c0_23 = arith.constant 0 : index
    %62 = vector.load %arg8[%61, %c0_22, %c0_23] : memref<8x2x32xbf16, #tpu.memory_space<vmem>>, vector<1x2x32xbf16>
    %63 = vector.shape_cast %62 : vector<1x2x32xbf16> to vector<2x32xbf16>
    %64 = vector.shape_cast %60 : vector<2x32xbf16> to vector<1x2x32xbf16>
    tpu.vector_store %arg8[%61, %c0_22, %c0_23], %64 {strides = array<i32>} : memref<8x2x32xbf16, #tpu.memory_space<vmem>>, vector<1x2x32xbf16>,
    %c1_i32 = arith.constant 1 : i32
    %65 = arith.index_cast %c1_i32 : i32 to index
    %c0_24 = arith.constant 0 : index
    %c0_25 = arith.constant 0 : index
    %66 = vector.load %arg3[%65, %c0_24, %c0_25] : memref<8x2x128xbf16, #tpu.memory_space<vmem>>, vector<1x2x128xbf16>
    %67 = vector.shape_cast %66 : vector<1x2x128xbf16> to vector<2x128xbf16>
    %68 = arith.extf %67 : vector<2x128xbf16> to vector<2x128xf32>
    %69 = vector.broadcast %4 : vector<1x128xf32> to vector<2x128xf32>
    %70 = arith.addf %68, %69 : vector<2x128xf32>
    %71 = arith.truncf %53 : vector<2x32xf32> to vector<2x32xbf16>
    %cst_26 = arith.constant dense<0.000000e+00> : vector<2x128xf32>
    %72 = tpu.matmul %71, %3, %cst_26 {dimension_numbers = #tpu.dot_dimension_numbers<[1], [0], [0], [1], [0, 0, 1, 1], [], []>} : vector<2x32xbf16>, vector<32x128xbf16>, vector<2x128xf32> -> vector<2x128xf32>
    %73 = arith.addf %70, %72 : vector<2x128xf32>
    %74 = vector.extract_strided_slice %73 {offsets = [0, 0], sizes = [2, 32], strides = [1, 1]} : vector<2x128xf32> to vector<2x32xf32>
    %cst_27 = arith.constant 5.000000e-01 : f32
    %75 = vector.broadcast %cst_27 : f32 to vector<2x32xf32>
    %76 = arith.mulf %75, %74 : vector<2x32xf32>
    %77 = math.tanh %76 : vector<2x32xf32>
    %cst_28 = arith.constant 5.000000e-01 : f32
    %78 = vector.broadcast %cst_28 : f32 to vector<2x32xf32>
    %79 = arith.mulf %78, %77 : vector<2x32xf32>
    %cst_29 = arith.constant 5.000000e-01 : f32
    %80 = vector.broadcast %cst_29 : f32 to vector<2x32xf32>
    %81 = arith.addf %79, %80 : vector<2x32xf32>
    %82 = vector.extract_strided_slice %73 {offsets = [0, 32], sizes = [2, 32], strides = [1, 1]} : vector<2x128xf32> to vector<2x32xf32>
    %cst_30 = arith.constant 5.000000e-01 : f32
    %83 = vector.broadcast %cst_30 : f32 to vector<2x32xf32>
    %84 = arith.mulf %83, %82 : vector<2x32xf32>
    %85 = math.tanh %84 : vector<2x32xf32>
    %cst_31 = arith.constant 5.000000e-01 : f32
    %86 = vector.broadcast %cst_31 : f32 to vector<2x32xf32>
    %87 = arith.mulf %86, %85 : vector<2x32xf32>
    %cst_32 = arith.constant 5.000000e-01 : f32
    %88 = vector.broadcast %cst_32 : f32 to vector<2x32xf32>
    %89 = arith.addf %87, %88 : vector<2x32xf32>
    %90 = vector.extract_strided_slice %73 {offsets = [0, 64], sizes = [2, 32], strides = [1, 1]} : vector<2x128xf32> to vector<2x32xf32>
    %91 = math.tanh %90 : vector<2x32xf32>
    %92 = vector.extract_strided_slice %73 {offsets = [0, 96], sizes = [2, 32], strides = [1, 1]} : vector<2x128xf32> to vector<2x32xf32>
    %cst_33 = arith.constant 5.000000e-01 : f32
    %93 = vector.broadcast %cst_33 : f32 to vector<2x32xf32>
    %94 = arith.mulf %93, %92 : vector<2x32xf32>
    %95 = math.tanh %94 : vector<2x32xf32>
    %cst_34 = arith.constant 5.000000e-01 : f32
    %96 = vector.broadcast %cst_34 : f32 to vector<2x32xf32>
    %97 = arith.mulf %96, %95 : vector<2x32xf32>
    %cst_35 = arith.constant 5.000000e-01 : f32
    %98 = vector.broadcast %cst_35 : f32 to vector<2x32xf32>
    %99 = arith.addf %97, %98 : vector<2x32xf32>
    %100 = arith.mulf %89, %57 : vector<2x32xf32>
    %101 = arith.mulf %81, %91 : vector<2x32xf32>
    %102 = arith.addf %100, %101 : vector<2x32xf32>
    %103 = math.tanh %102 : vector<2x32xf32>
    %104 = arith.mulf %99, %103 : vector<2x32xf32>
    %105 = arith.index_cast %c1_i32 : i32 to index
    %c0_36 = arith.constant 0 : index
    %c0_37 = arith.constant 0 : index
    %106 = vector.load %arg2[%105, %c0_36, %c0_37] : memref<8x2x1xf32, #tpu.memory_space<vmem>>, vector<1x2x1xf32>
    %107 = vector.shape_cast %106 : vector<1x2x1xf32> to vector<2x1xf32>
    %108 = arith.subf %104, %53 : vector<2x32xf32>
    %109 = vector.broadcast %107 : vector<2x1xf32> to vector<2x32xf32>
    %110 = arith.mulf %109, %108 : vector<2x32xf32>
    %111 = arith.addf %53, %110 : vector<2x32xf32>
    %112 = arith.subf %102, %57 : vector<2x32xf32>
    %113 = vector.broadcast %107 : vector<2x1xf32> to vector<2x32xf32>
    %114 = arith.mulf %113, %112 : vector<2x32xf32>
    %115 = arith.addf %57, %114 : vector<2x32xf32>
    %116 = vector.broadcast %107 : vector<2x1xf32> to vector<2x32xf32>
    %117 = arith.mulf %116, %104 : vector<2x32xf32>
    %118 = arith.truncf %117 : vector<2x32xf32> to vector<2x32xbf16>
    %119 = arith.index_cast %c1_i32 : i32 to index
    %c0_38 = arith.constant 0 : index
    %c0_39 = arith.constant 0 : index
    %120 = vector.load %arg8[%119, %c0_38, %c0_39] : memref<8x2x32xbf16, #tpu.memory_space<vmem>>, vector<1x2x32xbf16>
    %121 = vector.shape_cast %120 : vector<1x2x32xbf16> to vector<2x32xbf16>
    %122 = vector.shape_cast %118 : vector<2x32xbf16> to vector<1x2x32xbf16>
    tpu.vector_store %arg8[%119, %c0_38, %c0_39], %122 {strides = array<i32>} : memref<8x2x32xbf16, #tpu.memory_space<vmem>>, vector<1x2x32xbf16>,
    %c2_i32 = arith.constant 2 : i32
    %123 = arith.index_cast %c2_i32 : i32 to index
    %c0_40 = arith.constant 0 : index
    %c0_41 = arith.constant 0 : index
    %124 = vector.load %arg3[%123, %c0_40, %c0_41] : memref<8x2x128xbf16, #tpu.memory_space<vmem>>, vector<1x2x128xbf16>
    %125 = vector.shape_cast %124 : vector<1x2x128xbf16> to vector<2x128xbf16>
    %126 = arith.extf %125 : vector<2x128xbf16> to vector<2x128xf32>
    %127 = vector.broadcast %4 : vector<1x128xf32> to vector<2x128xf32>
    %128 = arith.addf %126, %127 : vector<2x128xf32>
    %129 = arith.truncf %111 : vector<2x32xf32> to vector<2x32xbf16>
    %cst_42 = arith.constant dense<0.000000e+00> : vector<2x128xf32>
    %130 = tpu.matmul %129, %3, %cst_42 {dimension_numbers = #tpu.dot_dimension_numbers<[1], [0], [0], [1], [0, 0, 1, 1], [], []>} : vector<2x32xbf16>, vector<32x128xbf16>, vector<2x128xf32> -> vector<2x128xf32>
    %131 = arith.addf %128, %130 : vector<2x128xf32>
    %132 = vector.extract_strided_slice %131 {offsets = [0, 0], sizes = [2, 32], strides = [1, 1]} : vector<2x128xf32> to vector<2x32xf32>
    %cst_43 = arith.constant 5.000000e-01 : f32
    %133 = vector.broadcast %cst_43 : f32 to vector<2x32xf32>
    %134 = arith.mulf %133, %132 : vector<2x32xf32>
    %135 = math.tanh %134 : vector<2x32xf32>
    %cst_44 = arith.constant 5.000000e-01 : f32
    %136 = vector.broadcast %cst_44 : f32 to vector<2x32xf32>
    %137 = arith.mulf %136, %135 : vector<2x32xf32>
    %cst_45 = arith.constant 5.000000e-01 : f32
    %138 = vector.broadcast %cst_45 : f32 to vector<2x32xf32>
    %139 = arith.addf %137, %138 : vector<2x32xf32>
    %140 = vector.extract_strided_slice %131 {offsets = [0, 32], sizes = [2, 32], strides = [1, 1]} : vector<2x128xf32> to vector<2x32xf32>
    %cst_46 = arith.constant 5.000000e-01 : f32
    %141 = vector.broadcast %cst_46 : f32 to vector<2x32xf32>
    %142 = arith.mulf %141, %140 : vector<2x32xf32>
    %143 = math.tanh %142 : vector<2x32xf32>
    %cst_47 = arith.constant 5.000000e-01 : f32
    %144 = vector.broadcast %cst_47 : f32 to vector<2x32xf32>
    %145 = arith.mulf %144, %143 : vector<2x32xf32>
    %cst_48 = arith.constant 5.000000e-01 : f32
    %146 = vector.broadcast %cst_48 : f32 to vector<2x32xf32>
    %147 = arith.addf %145, %146 : vector<2x32xf32>
    %148 = vector.extract_strided_slice %131 {offsets = [0, 64], sizes = [2, 32], strides = [1, 1]} : vector<2x128xf32> to vector<2x32xf32>
    %149 = math.tanh %148 : vector<2x32xf32>
    %150 = vector.extract_strided_slice %131 {offsets = [0, 96], sizes = [2, 32], strides = [1, 1]} : vector<2x128xf32> to vector<2x32xf32>
    %cst_49 = arith.constant 5.000000e-01 : f32
    %151 = vector.broadcast %cst_49 : f32 to vector<2x32xf32>
    %152 = arith.mulf %151, %150 : vector<2x32xf32>
    %153 = math.tanh %152 : vector<2x32xf32>
    %cst_50 = arith.constant 5.000000e-01 : f32
    %154 = vector.broadcast %cst_50 : f32 to vector<2x32xf32>
    %155 = arith.mulf %154, %153 : vector<2x32xf32>
    %cst_51 = arith.constant 5.000000e-01 : f32
    %156 = vector.broadcast %cst_51 : f32 to vector<2x32xf32>
    %157 = arith.addf %155, %156 : vector<2x32xf32>
    %158 = arith.mulf %147, %115 : vector<2x32xf32>
    %159 = arith.mulf %139, %149 : vector<2x32xf32>
    %160 = arith.addf %158, %159 : vector<2x32xf32>
    %161 = math.tanh %160 : vector<2x32xf32>
    %162 = arith.mulf %157, %161 : vector<2x32xf32>
    %163 = arith.index_cast %c2_i32 : i32 to index
    %c0_52 = arith.constant 0 : index
    %c0_53 = arith.constant 0 : index
    %164 = vector.load %arg2[%163, %c0_52, %c0_53] : memref<8x2x1xf32, #tpu.memory_space<vmem>>, vector<1x2x1xf32>
    %165 = vector.shape_cast %164 : vector<1x2x1xf32> to vector<2x1xf32>
    %166 = arith.subf %162, %111 : vector<2x32xf32>
    %167 = vector.broadcast %165 : vector<2x1xf32> to vector<2x32xf32>
    %168 = arith.mulf %167, %166 : vector<2x32xf32>
    %169 = arith.addf %111, %168 : vector<2x32xf32>
    %170 = arith.subf %160, %115 : vector<2x32xf32>
    %171 = vector.broadcast %165 : vector<2x1xf32> to vector<2x32xf32>
    %172 = arith.mulf %171, %170 : vector<2x32xf32>
    %173 = arith.addf %115, %172 : vector<2x32xf32>
    %174 = vector.broadcast %165 : vector<2x1xf32> to vector<2x32xf32>
    %175 = arith.mulf %174, %162 : vector<2x32xf32>
    %176 = arith.truncf %175 : vector<2x32xf32> to vector<2x32xbf16>
    %177 = arith.index_cast %c2_i32 : i32 to index
    %c0_54 = arith.constant 0 : index
    %c0_55 = arith.constant 0 : index
    %178 = vector.load %arg8[%177, %c0_54, %c0_55] : memref<8x2x32xbf16, #tpu.memory_space<vmem>>, vector<1x2x32xbf16>
    %179 = vector.shape_cast %178 : vector<1x2x32xbf16> to vector<2x32xbf16>
    %180 = vector.shape_cast %176 : vector<2x32xbf16> to vector<1x2x32xbf16>
    tpu.vector_store %arg8[%177, %c0_54, %c0_55], %180 {strides = array<i32>} : memref<8x2x32xbf16, #tpu.memory_space<vmem>>, vector<1x2x32xbf16>,
    %c3_i32 = arith.constant 3 : i32
    %181 = arith.index_cast %c3_i32 : i32 to index
    %c0_56 = arith.constant 0 : index
    %c0_57 = arith.constant 0 : index
    %182 = vector.load %arg3[%181, %c0_56, %c0_57] : memref<8x2x128xbf16, #tpu.memory_space<vmem>>, vector<1x2x128xbf16>
    %183 = vector.shape_cast %182 : vector<1x2x128xbf16> to vector<2x128xbf16>
    %184 = arith.extf %183 : vector<2x128xbf16> to vector<2x128xf32>
    %185 = vector.broadcast %4 : vector<1x128xf32> to vector<2x128xf32>
    %186 = arith.addf %184, %185 : vector<2x128xf32>
    %187 = arith.truncf %169 : vector<2x32xf32> to vector<2x32xbf16>
    %cst_58 = arith.constant dense<0.000000e+00> : vector<2x128xf32>
    %188 = tpu.matmul %187, %3, %cst_58 {dimension_numbers = #tpu.dot_dimension_numbers<[1], [0], [0], [1], [0, 0, 1, 1], [], []>} : vector<2x32xbf16>, vector<32x128xbf16>, vector<2x128xf32> -> vector<2x128xf32>
    %189 = arith.addf %186, %188 : vector<2x128xf32>
    %190 = vector.extract_strided_slice %189 {offsets = [0, 0], sizes = [2, 32], strides = [1, 1]} : vector<2x128xf32> to vector<2x32xf32>
    %cst_59 = arith.constant 5.000000e-01 : f32
    %191 = vector.broadcast %cst_59 : f32 to vector<2x32xf32>
    %192 = arith.mulf %191, %190 : vector<2x32xf32>
    %193 = math.tanh %192 : vector<2x32xf32>
    %cst_60 = arith.constant 5.000000e-01 : f32
    %194 = vector.broadcast %cst_60 : f32 to vector<2x32xf32>
    %195 = arith.mulf %194, %193 : vector<2x32xf32>
    %cst_61 = arith.constant 5.000000e-01 : f32
    %196 = vector.broadcast %cst_61 : f32 to vector<2x32xf32>
    %197 = arith.addf %195, %196 : vector<2x32xf32>
    %198 = vector.extract_strided_slice %189 {offsets = [0, 32], sizes = [2, 32], strides = [1, 1]} : vector<2x128xf32> to vector<2x32xf32>
    %cst_62 = arith.constant 5.000000e-01 : f32
    %199 = vector.broadcast %cst_62 : f32 to vector<2x32xf32>
    %200 = arith.mulf %199, %198 : vector<2x32xf32>
    %201 = math.tanh %200 : vector<2x32xf32>
    %cst_63 = arith.constant 5.000000e-01 : f32
    %202 = vector.broadcast %cst_63 : f32 to vector<2x32xf32>
    %203 = arith.mulf %202, %201 : vector<2x32xf32>
    %cst_64 = arith.constant 5.000000e-01 : f32
    %204 = vector.broadcast %cst_64 : f32 to vector<2x32xf32>
    %205 = arith.addf %203, %204 : vector<2x32xf32>
    %206 = vector.extract_strided_slice %189 {offsets = [0, 64], sizes = [2, 32], strides = [1, 1]} : vector<2x128xf32> to vector<2x32xf32>
    %207 = math.tanh %206 : vector<2x32xf32>
    %208 = vector.extract_strided_slice %189 {offsets = [0, 96], sizes = [2, 32], strides = [1, 1]} : vector<2x128xf32> to vector<2x32xf32>
    %cst_65 = arith.constant 5.000000e-01 : f32
    %209 = vector.broadcast %cst_65 : f32 to vector<2x32xf32>
    %210 = arith.mulf %209, %208 : vector<2x32xf32>
    %211 = math.tanh %210 : vector<2x32xf32>
    %cst_66 = arith.constant 5.000000e-01 : f32
    %212 = vector.broadcast %cst_66 : f32 to vector<2x32xf32>
    %213 = arith.mulf %212, %211 : vector<2x32xf32>
    %cst_67 = arith.constant 5.000000e-01 : f32
    %214 = vector.broadcast %cst_67 : f32 to vector<2x32xf32>
    %215 = arith.addf %213, %214 : vector<2x32xf32>
    %216 = arith.mulf %205, %173 : vector<2x32xf32>
    %217 = arith.mulf %197, %207 : vector<2x32xf32>
    %218 = arith.addf %216, %217 : vector<2x32xf32>
    %219 = math.tanh %218 : vector<2x32xf32>
    %220 = arith.mulf %215, %219 : vector<2x32xf32>
    %221 = arith.index_cast %c3_i32 : i32 to index
    %c0_68 = arith.constant 0 : index
    %c0_69 = arith.constant 0 : index
    %222 = vector.load %arg2[%221, %c0_68, %c0_69] : memref<8x2x1xf32, #tpu.memory_space<vmem>>, vector<1x2x1xf32>
    %223 = vector.shape_cast %222 : vector<1x2x1xf32> to vector<2x1xf32>
    %224 = arith.subf %220, %169 : vector<2x32xf32>
    %225 = vector.broadcast %223 : vector<2x1xf32> to vector<2x32xf32>
    %226 = arith.mulf %225, %224 : vector<2x32xf32>
    %227 = arith.addf %169, %226 : vector<2x32xf32>
    %228 = arith.subf %218, %173 : vector<2x32xf32>
    %229 = vector.broadcast %223 : vector<2x1xf32> to vector<2x32xf32>
    %230 = arith.mulf %229, %228 : vector<2x32xf32>
    %231 = arith.addf %173, %230 : vector<2x32xf32>
    %232 = vector.broadcast %223 : vector<2x1xf32> to vector<2x32xf32>
    %233 = arith.mulf %232, %220 : vector<2x32xf32>
    %234 = arith.truncf %233 : vector<2x32xf32> to vector<2x32xbf16>
    %235 = arith.index_cast %c3_i32 : i32 to index
    %c0_70 = arith.constant 0 : index
    %c0_71 = arith.constant 0 : index
    %236 = vector.load %arg8[%235, %c0_70, %c0_71] : memref<8x2x32xbf16, #tpu.memory_space<vmem>>, vector<1x2x32xbf16>
    %237 = vector.shape_cast %236 : vector<1x2x32xbf16> to vector<2x32xbf16>
    %238 = vector.shape_cast %234 : vector<2x32xbf16> to vector<1x2x32xbf16>
    tpu.vector_store %arg8[%235, %c0_70, %c0_71], %238 {strides = array<i32>} : memref<8x2x32xbf16, #tpu.memory_space<vmem>>, vector<1x2x32xbf16>,
    %c4_i32 = arith.constant 4 : i32
    %239 = arith.index_cast %c4_i32 : i32 to index
    %c0_72 = arith.constant 0 : index
    %c0_73 = arith.constant 0 : index
    %240 = vector.load %arg3[%239, %c0_72, %c0_73] : memref<8x2x128xbf16, #tpu.memory_space<vmem>>, vector<1x2x128xbf16>
    %241 = vector.shape_cast %240 : vector<1x2x128xbf16> to vector<2x128xbf16>
    %242 = arith.extf %241 : vector<2x128xbf16> to vector<2x128xf32>
    %243 = vector.broadcast %4 : vector<1x128xf32> to vector<2x128xf32>
    %244 = arith.addf %242, %243 : vector<2x128xf32>
    %245 = arith.truncf %227 : vector<2x32xf32> to vector<2x32xbf16>
    %cst_74 = arith.constant dense<0.000000e+00> : vector<2x128xf32>
    %246 = tpu.matmul %245, %3, %cst_74 {dimension_numbers = #tpu.dot_dimension_numbers<[1], [0], [0], [1], [0, 0, 1, 1], [], []>} : vector<2x32xbf16>, vector<32x128xbf16>, vector<2x128xf32> -> vector<2x128xf32>
    %247 = arith.addf %244, %246 : vector<2x128xf32>
    %248 = vector.extract_strided_slice %247 {offsets = [0, 0], sizes = [2, 32], strides = [1, 1]} : vector<2x128xf32> to vector<2x32xf32>
    %cst_75 = arith.constant 5.000000e-01 : f32
    %249 = vector.broadcast %cst_75 : f32 to vector<2x32xf32>
    %250 = arith.mulf %249, %248 : vector<2x32xf32>
    %251 = math.tanh %250 : vector<2x32xf32>
    %cst_76 = arith.constant 5.000000e-01 : f32
    %252 = vector.broadcast %cst_76 : f32 to vector<2x32xf32>
    %253 = arith.mulf %252, %251 : vector<2x32xf32>
    %cst_77 = arith.constant 5.000000e-01 : f32
    %254 = vector.broadcast %cst_77 : f32 to vector<2x32xf32>
    %255 = arith.addf %253, %254 : vector<2x32xf32>
    %256 = vector.extract_strided_slice %247 {offsets = [0, 32], sizes = [2, 32], strides = [1, 1]} : vector<2x128xf32> to vector<2x32xf32>
    %cst_78 = arith.constant 5.000000e-01 : f32
    %257 = vector.broadcast %cst_78 : f32 to vector<2x32xf32>
    %258 = arith.mulf %257, %256 : vector<2x32xf32>
    %259 = math.tanh %258 : vector<2x32xf32>
    %cst_79 = arith.constant 5.000000e-01 : f32
    %260 = vector.broadcast %cst_79 : f32 to vector<2x32xf32>
    %261 = arith.mulf %260, %259 : vector<2x32xf32>
    %cst_80 = arith.constant 5.000000e-01 : f32
    %262 = vector.broadcast %cst_80 : f32 to vector<2x32xf32>
    %263 = arith.addf %261, %262 : vector<2x32xf32>
    %264 = vector.extract_strided_slice %247 {offsets = [0, 64], sizes = [2, 32], strides = [1, 1]} : vector<2x128xf32> to vector<2x32xf32>
    %265 = math.tanh %264 : vector<2x32xf32>
    %266 = vector.extract_strided_slice %247 {offsets = [0, 96], sizes = [2, 32], strides = [1, 1]} : vector<2x128xf32> to vector<2x32xf32>
    %cst_81 = arith.constant 5.000000e-01 : f32
    %267 = vector.broadcast %cst_81 : f32 to vector<2x32xf32>
    %268 = arith.mulf %267, %266 : vector<2x32xf32>
    %269 = math.tanh %268 : vector<2x32xf32>
    %cst_82 = arith.constant 5.000000e-01 : f32
    %270 = vector.broadcast %cst_82 : f32 to vector<2x32xf32>
    %271 = arith.mulf %270, %269 : vector<2x32xf32>
    %cst_83 = arith.constant 5.000000e-01 : f32
    %272 = vector.broadcast %cst_83 : f32 to vector<2x32xf32>
    %273 = arith.addf %271, %272 : vector<2x32xf32>
    %274 = arith.mulf %263, %231 : vector<2x32xf32>
    %275 = arith.mulf %255, %265 : vector<2x32xf32>
    %276 = arith.addf %274, %275 : vector<2x32xf32>
    %277 = math.tanh %276 : vector<2x32xf32>
    %278 = arith.mulf %273, %277 : vector<2x32xf32>
    %279 = arith.index_cast %c4_i32 : i32 to index
    %c0_84 = arith.constant 0 : index
    %c0_85 = arith.constant 0 : index
    %280 = vector.load %arg2[%279, %c0_84, %c0_85] : memref<8x2x1xf32, #tpu.memory_space<vmem>>, vector<1x2x1xf32>
    %281 = vector.shape_cast %280 : vector<1x2x1xf32> to vector<2x1xf32>
    %282 = arith.subf %278, %227 : vector<2x32xf32>
    %283 = vector.broadcast %281 : vector<2x1xf32> to vector<2x32xf32>
    %284 = arith.mulf %283, %282 : vector<2x32xf32>
    %285 = arith.addf %227, %284 : vector<2x32xf32>
    %286 = arith.subf %276, %231 : vector<2x32xf32>
    %287 = vector.broadcast %281 : vector<2x1xf32> to vector<2x32xf32>
    %288 = arith.mulf %287, %286 : vector<2x32xf32>
    %289 = arith.addf %231, %288 : vector<2x32xf32>
    %290 = vector.broadcast %281 : vector<2x1xf32> to vector<2x32xf32>
    %291 = arith.mulf %290, %278 : vector<2x32xf32>
    %292 = arith.truncf %291 : vector<2x32xf32> to vector<2x32xbf16>
    %293 = arith.index_cast %c4_i32 : i32 to index
    %c0_86 = arith.constant 0 : index
    %c0_87 = arith.constant 0 : index
    %294 = vector.load %arg8[%293, %c0_86, %c0_87] : memref<8x2x32xbf16, #tpu.memory_space<vmem>>, vector<1x2x32xbf16>
    %295 = vector.shape_cast %294 : vector<1x2x32xbf16> to vector<2x32xbf16>
    %296 = vector.shape_cast %292 : vector<2x32xbf16> to vector<1x2x32xbf16>
    tpu.vector_store %arg8[%293, %c0_86, %c0_87], %296 {strides = array<i32>} : memref<8x2x32xbf16, #tpu.memory_space<vmem>>, vector<1x2x32xbf16>,
    %c5_i32 = arith.constant 5 : i32
    %297 = arith.index_cast %c5_i32 : i32 to index
    %c0_88 = arith.constant 0 : index
    %c0_89 = arith.constant 0 : index
    %298 = vector.load %arg3[%297, %c0_88, %c0_89] : memref<8x2x128xbf16, #tpu.memory_space<vmem>>, vector<1x2x128xbf16>
    %299 = vector.shape_cast %298 : vector<1x2x128xbf16> to vector<2x128xbf16>
    %300 = arith.extf %299 : vector<2x128xbf16> to vector<2x128xf32>
    %301 = vector.broadcast %4 : vector<1x128xf32> to vector<2x128xf32>
    %302 = arith.addf %300, %301 : vector<2x128xf32>
    %303 = arith.truncf %285 : vector<2x32xf32> to vector<2x32xbf16>
    %cst_90 = arith.constant dense<0.000000e+00> : vector<2x128xf32>
    %304 = tpu.matmul %303, %3, %cst_90 {dimension_numbers = #tpu.dot_dimension_numbers<[1], [0], [0], [1], [0, 0, 1, 1], [], []>} : vector<2x32xbf16>, vector<32x128xbf16>, vector<2x128xf32> -> vector<2x128xf32>
    %305 = arith.addf %302, %304 : vector<2x128xf32>
    %306 = vector.extract_strided_slice %305 {offsets = [0, 0], sizes = [2, 32], strides = [1, 1]} : vector<2x128xf32> to vector<2x32xf32>
    %cst_91 = arith.constant 5.000000e-01 : f32
    %307 = vector.broadcast %cst_91 : f32 to vector<2x32xf32>
    %308 = arith.mulf %307, %306 : vector<2x32xf32>
    %309 = math.tanh %308 : vector<2x32xf32>
    %cst_92 = arith.constant 5.000000e-01 : f32
    %310 = vector.broadcast %cst_92 : f32 to vector<2x32xf32>
    %311 = arith.mulf %310, %309 : vector<2x32xf32>
    %cst_93 = arith.constant 5.000000e-01 : f32
    %312 = vector.broadcast %cst_93 : f32 to vector<2x32xf32>
    %313 = arith.addf %311, %312 : vector<2x32xf32>
    %314 = vector.extract_strided_slice %305 {offsets = [0, 32], sizes = [2, 32], strides = [1, 1]} : vector<2x128xf32> to vector<2x32xf32>
    %cst_94 = arith.constant 5.000000e-01 : f32
    %315 = vector.broadcast %cst_94 : f32 to vector<2x32xf32>
    %316 = arith.mulf %315, %314 : vector<2x32xf32>
    %317 = math.tanh %316 : vector<2x32xf32>
    %cst_95 = arith.constant 5.000000e-01 : f32
    %318 = vector.broadcast %cst_95 : f32 to vector<2x32xf32>
    %319 = arith.mulf %318, %317 : vector<2x32xf32>
    %cst_96 = arith.constant 5.000000e-01 : f32
    %320 = vector.broadcast %cst_96 : f32 to vector<2x32xf32>
    %321 = arith.addf %319, %320 : vector<2x32xf32>
    %322 = vector.extract_strided_slice %305 {offsets = [0, 64], sizes = [2, 32], strides = [1, 1]} : vector<2x128xf32> to vector<2x32xf32>
    %323 = math.tanh %322 : vector<2x32xf32>
    %324 = vector.extract_strided_slice %305 {offsets = [0, 96], sizes = [2, 32], strides = [1, 1]} : vector<2x128xf32> to vector<2x32xf32>
    %cst_97 = arith.constant 5.000000e-01 : f32
    %325 = vector.broadcast %cst_97 : f32 to vector<2x32xf32>
    %326 = arith.mulf %325, %324 : vector<2x32xf32>
    %327 = math.tanh %326 : vector<2x32xf32>
    %cst_98 = arith.constant 5.000000e-01 : f32
    %328 = vector.broadcast %cst_98 : f32 to vector<2x32xf32>
    %329 = arith.mulf %328, %327 : vector<2x32xf32>
    %cst_99 = arith.constant 5.000000e-01 : f32
    %330 = vector.broadcast %cst_99 : f32 to vector<2x32xf32>
    %331 = arith.addf %329, %330 : vector<2x32xf32>
    %332 = arith.mulf %321, %289 : vector<2x32xf32>
    %333 = arith.mulf %313, %323 : vector<2x32xf32>
    %334 = arith.addf %332, %333 : vector<2x32xf32>
    %335 = math.tanh %334 : vector<2x32xf32>
    %336 = arith.mulf %331, %335 : vector<2x32xf32>
    %337 = arith.index_cast %c5_i32 : i32 to index
    %c0_100 = arith.constant 0 : index
    %c0_101 = arith.constant 0 : index
    %338 = vector.load %arg2[%337, %c0_100, %c0_101] : memref<8x2x1xf32, #tpu.memory_space<vmem>>, vector<1x2x1xf32>
    %339 = vector.shape_cast %338 : vector<1x2x1xf32> to vector<2x1xf32>
    %340 = arith.subf %336, %285 : vector<2x32xf32>
    %341 = vector.broadcast %339 : vector<2x1xf32> to vector<2x32xf32>
    %342 = arith.mulf %341, %340 : vector<2x32xf32>
    %343 = arith.addf %285, %342 : vector<2x32xf32>
    %344 = arith.subf %334, %289 : vector<2x32xf32>
    %345 = vector.broadcast %339 : vector<2x1xf32> to vector<2x32xf32>
    %346 = arith.mulf %345, %344 : vector<2x32xf32>
    %347 = arith.addf %289, %346 : vector<2x32xf32>
    %348 = vector.broadcast %339 : vector<2x1xf32> to vector<2x32xf32>
    %349 = arith.mulf %348, %336 : vector<2x32xf32>
    %350 = arith.truncf %349 : vector<2x32xf32> to vector<2x32xbf16>
    %351 = arith.index_cast %c5_i32 : i32 to index
    %c0_102 = arith.constant 0 : index
    %c0_103 = arith.constant 0 : index
    %352 = vector.load %arg8[%351, %c0_102, %c0_103] : memref<8x2x32xbf16, #tpu.memory_space<vmem>>, vector<1x2x32xbf16>
    %353 = vector.shape_cast %352 : vector<1x2x32xbf16> to vector<2x32xbf16>
    %354 = vector.shape_cast %350 : vector<2x32xbf16> to vector<1x2x32xbf16>
    tpu.vector_store %arg8[%351, %c0_102, %c0_103], %354 {strides = array<i32>} : memref<8x2x32xbf16, #tpu.memory_space<vmem>>, vector<1x2x32xbf16>,
    %c6_i32 = arith.constant 6 : i32
    %355 = arith.index_cast %c6_i32 : i32 to index
    %c0_104 = arith.constant 0 : index
    %c0_105 = arith.constant 0 : index
    %356 = vector.load %arg3[%355, %c0_104, %c0_105] : memref<8x2x128xbf16, #tpu.memory_space<vmem>>, vector<1x2x128xbf16>
    %357 = vector.shape_cast %356 : vector<1x2x128xbf16> to vector<2x128xbf16>
    %358 = arith.extf %357 : vector<2x128xbf16> to vector<2x128xf32>
    %359 = vector.broadcast %4 : vector<1x128xf32> to vector<2x128xf32>
    %360 = arith.addf %358, %359 : vector<2x128xf32>
    %361 = arith.truncf %343 : vector<2x32xf32> to vector<2x32xbf16>
    %cst_106 = arith.constant dense<0.000000e+00> : vector<2x128xf32>
    %362 = tpu.matmul %361, %3, %cst_106 {dimension_numbers = #tpu.dot_dimension_numbers<[1], [0], [0], [1], [0, 0, 1, 1], [], []>} : vector<2x32xbf16>, vector<32x128xbf16>, vector<2x128xf32> -> vector<2x128xf32>
    %363 = arith.addf %360, %362 : vector<2x128xf32>
    %364 = vector.extract_strided_slice %363 {offsets = [0, 0], sizes = [2, 32], strides = [1, 1]} : vector<2x128xf32> to vector<2x32xf32>
    %cst_107 = arith.constant 5.000000e-01 : f32
    %365 = vector.broadcast %cst_107 : f32 to vector<2x32xf32>
    %366 = arith.mulf %365, %364 : vector<2x32xf32>
    %367 = math.tanh %366 : vector<2x32xf32>
    %cst_108 = arith.constant 5.000000e-01 : f32
    %368 = vector.broadcast %cst_108 : f32 to vector<2x32xf32>
    %369 = arith.mulf %368, %367 : vector<2x32xf32>
    %cst_109 = arith.constant 5.000000e-01 : f32
    %370 = vector.broadcast %cst_109 : f32 to vector<2x32xf32>
    %371 = arith.addf %369, %370 : vector<2x32xf32>
    %372 = vector.extract_strided_slice %363 {offsets = [0, 32], sizes = [2, 32], strides = [1, 1]} : vector<2x128xf32> to vector<2x32xf32>
    %cst_110 = arith.constant 5.000000e-01 : f32
    %373 = vector.broadcast %cst_110 : f32 to vector<2x32xf32>
    %374 = arith.mulf %373, %372 : vector<2x32xf32>
    %375 = math.tanh %374 : vector<2x32xf32>
    %cst_111 = arith.constant 5.000000e-01 : f32
    %376 = vector.broadcast %cst_111 : f32 to vector<2x32xf32>
    %377 = arith.mulf %376, %375 : vector<2x32xf32>
    %cst_112 = arith.constant 5.000000e-01 : f32
    %378 = vector.broadcast %cst_112 : f32 to vector<2x32xf32>
    %379 = arith.addf %377, %378 : vector<2x32xf32>
    %380 = vector.extract_strided_slice %363 {offsets = [0, 64], sizes = [2, 32], strides = [1, 1]} : vector<2x128xf32> to vector<2x32xf32>
    %381 = math.tanh %380 : vector<2x32xf32>
    %382 = vector.extract_strided_slice %363 {offsets = [0, 96], sizes = [2, 32], strides = [1, 1]} : vector<2x128xf32> to vector<2x32xf32>
    %cst_113 = arith.constant 5.000000e-01 : f32
    %383 = vector.broadcast %cst_113 : f32 to vector<2x32xf32>
    %384 = arith.mulf %383, %382 : vector<2x32xf32>
    %385 = math.tanh %384 : vector<2x32xf32>
    %cst_114 = arith.constant 5.000000e-01 : f32
    %386 = vector.broadcast %cst_114 : f32 to vector<2x32xf32>
    %387 = arith.mulf %386, %385 : vector<2x32xf32>
    %cst_115 = arith.constant 5.000000e-01 : f32
    %388 = vector.broadcast %cst_115 : f32 to vector<2x32xf32>
    %389 = arith.addf %387, %388 : vector<2x32xf32>
    %390 = arith.mulf %379, %347 : vector<2x32xf32>
    %391 = arith.mulf %371, %381 : vector<2x32xf32>
    %392 = arith.addf %390, %391 : vector<2x32xf32>
    %393 = math.tanh %392 : vector<2x32xf32>
    %394 = arith.mulf %389, %393 : vector<2x32xf32>
    %395 = arith.index_cast %c6_i32 : i32 to index
    %c0_116 = arith.constant 0 : index
    %c0_117 = arith.constant 0 : index
    %396 = vector.load %arg2[%395, %c0_116, %c0_117] : memref<8x2x1xf32, #tpu.memory_space<vmem>>, vector<1x2x1xf32>
    %397 = vector.shape_cast %396 : vector<1x2x1xf32> to vector<2x1xf32>
    %398 = arith.subf %394, %343 : vector<2x32xf32>
    %399 = vector.broadcast %397 : vector<2x1xf32> to vector<2x32xf32>
    %400 = arith.mulf %399, %398 : vector<2x32xf32>
    %401 = arith.addf %343, %400 : vector<2x32xf32>
    %402 = arith.subf %392, %347 : vector<2x32xf32>
    %403 = vector.broadcast %397 : vector<2x1xf32> to vector<2x32xf32>
    %404 = arith.mulf %403, %402 : vector<2x32xf32>
    %405 = arith.addf %347, %404 : vector<2x32xf32>
    %406 = vector.broadcast %397 : vector<2x1xf32> to vector<2x32xf32>
    %407 = arith.mulf %406, %394 : vector<2x32xf32>
    %408 = arith.truncf %407 : vector<2x32xf32> to vector<2x32xbf16>
    %409 = arith.index_cast %c6_i32 : i32 to index
    %c0_118 = arith.constant 0 : index
    %c0_119 = arith.constant 0 : index
    %410 = vector.load %arg8[%409, %c0_118, %c0_119] : memref<8x2x32xbf16, #tpu.memory_space<vmem>>, vector<1x2x32xbf16>
    %411 = vector.shape_cast %410 : vector<1x2x32xbf16> to vector<2x32xbf16>
    %412 = vector.shape_cast %408 : vector<2x32xbf16> to vector<1x2x32xbf16>
    tpu.vector_store %arg8[%409, %c0_118, %c0_119], %412 {strides = array<i32>} : memref<8x2x32xbf16, #tpu.memory_space<vmem>>, vector<1x2x32xbf16>,
    %c7_i32 = arith.constant 7 : i32
    %413 = arith.index_cast %c7_i32 : i32 to index
    %c0_120 = arith.constant 0 : index
    %c0_121 = arith.constant 0 : index
    %414 = vector.load %arg3[%413, %c0_120, %c0_121] : memref<8x2x128xbf16, #tpu.memory_space<vmem>>, vector<1x2x128xbf16>
    %415 = vector.shape_cast %414 : vector<1x2x128xbf16> to vector<2x128xbf16>
    %416 = arith.extf %415 : vector<2x128xbf16> to vector<2x128xf32>
    %417 = vector.broadcast %4 : vector<1x128xf32> to vector<2x128xf32>
    %418 = arith.addf %416, %417 : vector<2x128xf32>
    %419 = arith.truncf %401 : vector<2x32xf32> to vector<2x32xbf16>
    %cst_122 = arith.constant dense<0.000000e+00> : vector<2x128xf32>
    %420 = tpu.matmul %419, %3, %cst_122 {dimension_numbers = #tpu.dot_dimension_numbers<[1], [0], [0], [1], [0, 0, 1, 1], [], []>} : vector<2x32xbf16>, vector<32x128xbf16>, vector<2x128xf32> -> vector<2x128xf32>
    %421 = arith.addf %418, %420 : vector<2x128xf32>
    %422 = vector.extract_strided_slice %421 {offsets = [0, 0], sizes = [2, 32], strides = [1, 1]} : vector<2x128xf32> to vector<2x32xf32>
    %cst_123 = arith.constant 5.000000e-01 : f32
    %423 = vector.broadcast %cst_123 : f32 to vector<2x32xf32>
    %424 = arith.mulf %423, %422 : vector<2x32xf32>
    %425 = math.tanh %424 : vector<2x32xf32>
    %cst_124 = arith.constant 5.000000e-01 : f32
    %426 = vector.broadcast %cst_124 : f32 to vector<2x32xf32>
    %427 = arith.mulf %426, %425 : vector<2x32xf32>
    %cst_125 = arith.constant 5.000000e-01 : f32
    %428 = vector.broadcast %cst_125 : f32 to vector<2x32xf32>
    %429 = arith.addf %427, %428 : vector<2x32xf32>
    %430 = vector.extract_strided_slice %421 {offsets = [0, 32], sizes = [2, 32], strides = [1, 1]} : vector<2x128xf32> to vector<2x32xf32>
    %cst_126 = arith.constant 5.000000e-01 : f32
    %431 = vector.broadcast %cst_126 : f32 to vector<2x32xf32>
    %432 = arith.mulf %431, %430 : vector<2x32xf32>
    %433 = math.tanh %432 : vector<2x32xf32>
    %cst_127 = arith.constant 5.000000e-01 : f32
    %434 = vector.broadcast %cst_127 : f32 to vector<2x32xf32>
    %435 = arith.mulf %434, %433 : vector<2x32xf32>
    %cst_128 = arith.constant 5.000000e-01 : f32
    %436 = vector.broadcast %cst_128 : f32 to vector<2x32xf32>
    %437 = arith.addf %435, %436 : vector<2x32xf32>
    %438 = vector.extract_strided_slice %421 {offsets = [0, 64], sizes = [2, 32], strides = [1, 1]} : vector<2x128xf32> to vector<2x32xf32>
    %439 = math.tanh %438 : vector<2x32xf32>
    %440 = vector.extract_strided_slice %421 {offsets = [0, 96], sizes = [2, 32], strides = [1, 1]} : vector<2x128xf32> to vector<2x32xf32>
    %cst_129 = arith.constant 5.000000e-01 : f32
    %441 = vector.broadcast %cst_129 : f32 to vector<2x32xf32>
    %442 = arith.mulf %441, %440 : vector<2x32xf32>
    %443 = math.tanh %442 : vector<2x32xf32>
    %cst_130 = arith.constant 5.000000e-01 : f32
    %444 = vector.broadcast %cst_130 : f32 to vector<2x32xf32>
    %445 = arith.mulf %444, %443 : vector<2x32xf32>
    %cst_131 = arith.constant 5.000000e-01 : f32
    %446 = vector.broadcast %cst_131 : f32 to vector<2x32xf32>
    %447 = arith.addf %445, %446 : vector<2x32xf32>
    %448 = arith.mulf %437, %405 : vector<2x32xf32>
    %449 = arith.mulf %429, %439 : vector<2x32xf32>
    %450 = arith.addf %448, %449 : vector<2x32xf32>
    %451 = math.tanh %450 : vector<2x32xf32>
    %452 = arith.mulf %447, %451 : vector<2x32xf32>
    %453 = arith.index_cast %c7_i32 : i32 to index
    %c0_132 = arith.constant 0 : index
    %c0_133 = arith.constant 0 : index
    %454 = vector.load %arg2[%453, %c0_132, %c0_133] : memref<8x2x1xf32, #tpu.memory_space<vmem>>, vector<1x2x1xf32>
    %455 = vector.shape_cast %454 : vector<1x2x1xf32> to vector<2x1xf32>
    %456 = arith.subf %452, %401 : vector<2x32xf32>
    %457 = vector.broadcast %455 : vector<2x1xf32> to vector<2x32xf32>
    %458 = arith.mulf %457, %456 : vector<2x32xf32>
    %459 = arith.addf %401, %458 : vector<2x32xf32>
    %460 = arith.subf %450, %405 : vector<2x32xf32>
    %461 = vector.broadcast %455 : vector<2x1xf32> to vector<2x32xf32>
    %462 = arith.mulf %461, %460 : vector<2x32xf32>
    %463 = arith.addf %405, %462 : vector<2x32xf32>
    %464 = vector.broadcast %455 : vector<2x1xf32> to vector<2x32xf32>
    %465 = arith.mulf %464, %452 : vector<2x32xf32>
    %466 = arith.truncf %465 : vector<2x32xf32> to vector<2x32xbf16>
    %467 = arith.index_cast %c7_i32 : i32 to index
    %c0_134 = arith.constant 0 : index
    %c0_135 = arith.constant 0 : index
    %468 = vector.load %arg8[%467, %c0_134, %c0_135] : memref<8x2x32xbf16, #tpu.memory_space<vmem>>, vector<1x2x32xbf16>
    %469 = vector.shape_cast %468 : vector<1x2x32xbf16> to vector<2x32xbf16>
    %470 = vector.shape_cast %466 : vector<2x32xbf16> to vector<1x2x32xbf16>
    tpu.vector_store %arg8[%467, %c0_134, %c0_135], %470 {strides = array<i32>} : memref<8x2x32xbf16, #tpu.memory_space<vmem>>, vector<1x2x32xbf16>,
    %c8_i32 = arith.constant 8 : i32
    %c0_136 = arith.constant 0 : index
    %c0_137 = arith.constant 0 : index
    %471 = vector.load %arg9[%c0_136, %c0_137] : memref<2x32xf32, #tpu.memory_space<vmem>>, vector<2x32xf32>
    tpu.vector_store %arg9[%c0_136, %c0_137], %459 {strides = array<i32>} : memref<2x32xf32, #tpu.memory_space<vmem>>, vector<2x32xf32>,
    %c0_138 = arith.constant 0 : index
    %c0_139 = arith.constant 0 : index
    %472 = vector.load %arg10[%c0_138, %c0_139] : memref<2x32xf32, #tpu.memory_space<vmem>>, vector<2x32xf32>
    tpu.vector_store %arg10[%c0_138, %c0_139], %463 {strides = array<i32>} : memref<2x32xf32, #tpu.memory_space<vmem>>, vector<2x32xf32>,
    return
  }
  func.func @transform_0(%arg0: i32, %arg1: i32) -> (i32, i32, i32) {
    %c0_i32 = arith.constant 0 : i32
    %c0_i32_0 = arith.constant 0 : i32
    return %arg1, %arg0, %c0_i32 : i32, i32, i32
  }
  func.func @transform_1(%arg0: i32, %arg1: i32) -> (i32, i32, i32) {
    %c0_i32 = arith.constant 0 : i32
    %c0_i32_0 = arith.constant 0 : i32
    return %arg1, %arg0, %c0_i32 : i32, i32, i32
  }
  func.func @transform_2(%arg0: i32, %arg1: i32) -> (i32, i32) {
    %c0_i32 = arith.constant 0 : i32
    %c0_i32_0 = arith.constant 0 : i32
    %c0_i32_1 = arith.constant 0 : i32
    return %c0_i32, %c0_i32_0 : i32, i32
  }
  func.func @transform_3(%arg0: i32, %arg1: i32) -> (i32, i32) {
    %c0_i32 = arith.constant 0 : i32
    %c0_i32_0 = arith.constant 0 : i32
    %c0_i32_1 = arith.constant 0 : i32
    return %c0_i32, %c0_i32_0 : i32, i32
  }
  func.func @transform_4(%arg0: i32, %arg1: i32) -> (i32, i32) {
    %c0_i32 = arith.constant 0 : i32
    %c0_i32_0 = arith.constant 0 : i32
    return %arg0, %c0_i32 : i32, i32
  }
  func.func @transform_5(%arg0: i32, %arg1: i32) -> (i32, i32) {
    %c0_i32 = arith.constant 0 : i32
    %c0_i32_0 = arith.constant 0 : i32
    return %arg0, %c0_i32 : i32, i32
  }
  func.func @transform_6(%arg0: i32, %arg1: i32) -> (i32, i32, i32) {
    %c0_i32 = arith.constant 0 : i32
    %c0_i32_0 = arith.constant 0 : i32
    return %arg1, %arg0, %c0_i32 : i32, i32, i32
  }
  func.func @transform_7(%arg0: i32, %arg1: i32) -> (i32, i32) {
    %c0_i32 = arith.constant 0 : i32
    %c0_i32_0 = arith.constant 0 : i32
    return %arg0, %c0_i32 : i32, i32
  }
  func.func @transform_8(%arg0: i32, %arg1: i32) -> (i32, i32) {
    %c0_i32 = arith.constant 0 : i32
    %c0_i32_0 = arith.constant 0 : i32
    return %arg0, %c0_i32 : i32, i32
  }
}

</mosaic_0001>

<bundles_post_ra>
// kernel: tpu_custom_call.1
= control target key start
LH: loop header
LB: loop body
LE: loop exit
PB: predicated region body
PF: predicated region fallthrough
CT: control target
= control target key end

     0   :  { %s2107_s0 = inlined_call_operand.vmem [shape: f32[16,2,1], index: 0, kind: input, shape index: {}]   ;;  %s2108_s1 = inlined_call_operand.vmem [shape: bf16[16,2,128], index: 1, kind: input, shape index: {}]   ;;  %s2109_s2 = inlined_call_operand.hbm [shape: f32[1,128], index: 2, kind: input, shape index: {}]   ;;  %s2110_s3 = inlined_call_operand.vmem [shape: bf16[32,128], index: 3, kind: input, shape index: {}]   ;;  %s2111_s4 = inlined_call_operand.vmem [shape: f32[2,32], index: 4, kind: input, shape index: {}]   ;;  %s2112_s5 = inlined_call_operand.vmem [shape: f32[2,32], index: 5, kind: input, shape index: {}]   ;;  %s2113_s6 = inlined_call_operand.hbm [shape: bf16[16,2,32], index: 6, kind: output, shape index: {0}]   ;;  %s2114_s7 = inlined_call_operand.hbm [shape: f32[2,32], index: 7, kind: output, shape index: {1}]   ;;  %s2115_s8 = inlined_call_operand.hbm [shape: f32[2,32], index: 8, kind: output, shape index: {2}]  }
   0x1   :  { %2119 = sst [smem:[#allocation15_spill]] %s2109_s2 }
   0x2   :  { %14 = vsyncpa [#allocation3], 0 }
   0x3   :  { %15 = vsyncpa [#allocation4], 0 }
   0x4   :  { %17 = vsyncpa [#allocation4 + $0x1], 0 }
   0x5   :  { %18 = vsyncpa [#allocation7], 0  ;;  %s1773_s27 = smov 0   ;;  %s1775_s28 = smov 0  }
   0x6   :  { %s1777_s29 = smov 0   ;;  %s1779_s30 = smov 0  }
   0x7   :  { %s1781_s9 = smov 0   ;;  %s1783_s10 = smov 0  }
   0x8 LB: > { %2120 = sst [smem:[#allocation12_spill]] %s1713_s9  ;;  %s1346_s11 = sadd.s32 4294967295, %s1717_s10   ;;  %s1717_s10 = sphi %s1783_s10, %s24_s10   ;;  %s1713_s9 = sphi %s1781_s9, %s2130_s9   ;;  %s1709_s30 = sphi %s1779_s30, %s2129_s30   ;;  %s1705_s29 = sphi %s1777_s29, %s2133_s29   ;;  %s1701_s28 = sphi %s1775_s28, %s2132_s28   ;;  %s1697_s27 = sphi %s1773_s27, %s2131_s27  }
   0x9   : > { %s1347_s12 = sadd.s32 4294967294, %s1717_s10   ;;  %s33_s13 = sadd.s32 1, %s1713_s9 }
   0xa   : > { %s195_s14 = sadd.s32 1, %s1705_s29  ;;  %p34_p0 = scmp.ge.s32.totalorder %s33_s13, 2 }
   0xb   : > { %p205_p1 = scmp.ne.s32.totalorder %s1705_s29, %s1701_s28  ;;  %p1809_p2 = scmp.eq.s32.totalorder %s1346_s11, 1 }
   0xc   : > { %p211_p3 = scmp.ne.s32.totalorder %s1701_s28, %s1697_s27  ;;  %s2135_s13 = smov (%p34_p0, %s33_s13), 0 }
   0xd   : > { %2122 = sst [smem:[#allocation13_spill]] %s2135_s13  ;;  %p1819_p4 = por %p1809_p2, %p205_p1 }
   0xe   : > { %p212_p5 = scmp.eq.s32.totalorder %s1347_s12, 1  ;;  %s190_s17 = ssub.s32 %s1713_s9, %s2135_s13 }
   0xf   : > { %p1348_p6 = scmp.ge.s32.totalorder %s1717_s10, 1  ;;  %p193_p7 = scmp.eq.s32.totalorder %s190_s17, 0 }
  0x10   : > { %p1826_p8 = por %p212_p5, %p211_p3  ;;  %p271_p9 = scmp.lt.s32.totalorder %s1717_s10, 3 }
  0x11   : > { %s1832_s19 = scalar_select %p193_p7, %s1705_s29, %s195_s14  }
  0x12   : > { %p272_p10 = pnand %p1348_p6, %p271_p9  ;;  %p1429_p11 = scmp.eq.s32.totalorder %s1346_s11, 0 }
  0x13   : > { %2125 = sst [smem:[#allocation14_spill]] %s1832_s19  ;;  %s1719_s23 = smov [#allocation2]  }
  0x14   : > { %s2126_s2 = sld [smem:[#allocation15_spill]]  ;;  %p1421_p12 = pneg %p272_p10 }
  0x15   : > { %s285_s24 = sshll.u32 %s1719_s23, 4  ;;  %s286_s24 = int_to_ptr.vmem [resolvable:$true] %s285_s24 }
  0x16   : > { %p1422_p13 = pnand %p1429_p11, %p1421_p12 }
  0x17   : > { %338 = sbr.rel (%p272_p10) target bundleno = 4894 (0x131e), region = 44 }
  0x1a   : > { %s283_s22 = sshll.u32 %s2126_s2, 4  ;;  %s284_s22 = int_to_ptr.hbm [resolvable:$true] %s283_s22 }
  0x1b   : > { %1424 = dma.hbm_to_vmem [thread:$0]  (!%p1422_p13), %s284_s22, 16, %s286_s24, [#allocation3]  }
  0x1c   : > { %1684 = dma.done.wait (%p1429_p11), [#allocation3], 16  }
  0x1d   : > { %1686 = vsyncadd (%p1429_p11), [#allocation3], 4294967280  ;;  %s2117_s25 = sand.u32 1, %s1701_s28   ;;  %s1839_s26 = sshll.u32 %s1709_s30, 3 }
  0x1e   : > { %s1355_s11 = sshll.u32 %s2117_s25, 3  ;;  %p392_p0 = scmp.lt.s32.totalorder %s1839_s26, 15 }
  0x1f   : > { %s1855_s2 = scalar_lea.vmem [#allocation5], %s1355_s11  ;;  %p1359_p1 = scmp.ne.s32.totalorder %s1709_s30, 0 }
  0x20   : > { %s393_s12 = scalar_select %p392_p0, %s1839_s26, 15 }
  0x21   : > { %421 = sbr.rel (%p1359_p1) target bundleno = 41 (0x29), region = 52 }
  0x22   : > { %s1357_s14 = sshll.u32 %s393_s12, 1  ;;  %s1848_s21 = scalar_lea.vmem %s2108_s1, %s393_s12 }
  0x23   : > { %s1853_s24 = scalar_lea.vmem %s2107_s0, %s1357_s14 }
  0x26   : > { %v422_v0 = vld [vmem:[%s2111_s4] sm:$0x3]  ;;  %vm423_vm0 = vcmask 254976  }
  0x27   : > { %v425_v1 = vld [vmem:[%s2112_s5] sm:$0x3]  ;;  %424 = vst.msk [vmem:[#allocation6] sm:$0x3] %vm423_vm0, %v422_v0 }
  0x28   : > { %426 = vst.msk [vmem:[#allocation8] sm:$0x3] %vm423_vm0, %v425_v1 }
  0x29 PF: > { %v1406_v2 = vld [vmem:[%s2110_s3 + $0x8] sm:$0xff]  ;;  %v1405_v3 = vld [vmem:[%s2110_s3] sm:$0xff]  ;;  %vm453_vm1 = vcmask 261120   ;;  %s1720_s9 = smov 64   ;;  %s1721_s13 = smov 32   ;;  %v1723_v27 = vmov 0  }
  0x2a   : > { %463 = vmatpush.bf16.msra.mxu0 %v1406_v2  ;;  %549 = vmatpush.bf16.msra.mxu1 %v1406_v2  ;;  %v434_v6 = vld [vmem:[%s1848_s21] sm:$0x1]  ;;  %v1876_v8 = vld [vmem:[#allocation2] ss:$0 sm:$0xff]  ;;  %s1722_s19 = smov 96   ;;  %vm533_vm2 = vcmask 253952  }
  0x2b   : > { %636 = vmatpush.bf16.msra.mxu2 %v1406_v2  ;;  %723 = vmatpush.bf16.msra.mxu3 %v1406_v2  ;;  %v435_v7 = vunpack.c.l.bf16 %v434_v6  ;;  %v497_v26 = vld [vmem:[%s1853_s24] sm:$0x3]  ;;  %v1371_v56 = vld [vmem:[%s1853_s24 + $0x2] sm:$0x3]  ;;  %vm1144_vm3 = vcmask 254976   ;;  %s1724_s25 = smov [#allocation6]  }
  0x2c   : > { %1493 = vset.pattern.permute.xlu2 %v1723_v27  ;;  %1494 = vset.pattern.permute.xlu1 %v1723_v27  ;;  %v1369_v43 = vld [vmem:[%s1848_s21 + $0x1] sm:$0x1]  ;;  %s1177_s17 = sshll.u32 %s1724_s25, 4  ;;  %s1179_s22 = sshll.u32 %s2114_s7, 4  ;;  %s1178_s17 = int_to_ptr.vmem [resolvable:$true] %s1177_s17  ;;  %s1180_s22 = int_to_ptr.hbm [resolvable:$true] %s1179_s22 }
  0x2d   : > { %v439_v9 = vadd.f32 %v1876_v8, %v435_v7  ;;  %1495 = vset.pattern.permute.xlu0 %v1723_v27  ;;  %v537_v44 = vunpack.c.l.bf16 %v1369_v43  ;;  %s1725_s23 = smov [#allocation8]   ;;  %s1193_s11 = sshll.u32 %s2115_s8, 4  ;;  %s1194_s11 = int_to_ptr.hbm [resolvable:$true] %s1193_s11 }
  0x2e   : > { %v1870_v4 = vld [vmem:[#allocation6] sm:$0x3]  ;;  %464 = vmatpush.bf16.msra.mxu0 %v1405_v3  ;;  %550 = vmatpush.bf16.msra.mxu1 %v1405_v3  ;;  %s2127_s20 = sand.u32 1, %s1701_s28  }
  0x2f   : > { %v440_v5 = vpack.c.bf16 %v1870_v4, %v1870_v4  ;;  %637 = vmatpush.bf16.msra.mxu2 %v1405_v3  ;;  %724 = vmatpush.bf16.msra.mxu3 %v1405_v3  ;;  %v433_v14 = vld [vmem:[#allocation8] sm:$0x3]  ;;  %v538_v45 = vadd.f32 %v1876_v8, %v537_v44 }
  0x30   : > { %499 = vrot.lane.b32.xlu2 %v1870_v4, %s1722_s19 }
  0x31   : > { %1368 = vmatmul.msk.bf16.vlgmr.msra.gmra.mxu0 %vm453_vm1, %v440_v5 }
  0x32   : > { %810 = vmatpush.bf16.msrb.mxu0 %v1406_v2  ;;  %897 = vmatpush.bf16.msrb.mxu1 %v1406_v2 }
  0x33   : > { %984 = vmatpush.bf16.msrb.mxu2 %v1406_v2  ;;  %1071 = vmatpush.bf16.msrb.mxu3 %v1406_v2 }
  0x36   : > { %811 = vmatpush.bf16.msrb.mxu0 %v1405_v3  ;;  %898 = vmatpush.bf16.msrb.mxu1 %v1405_v3 }
  0x37   : > { %985 = vmatpush.bf16.msrb.mxu2 %v1405_v3  ;;  %1072 = vmatpush.bf16.msrb.mxu3 %v1405_v3 }
  0x38   : > { %505 = vperm.xlu2 %1493, %v497_v26  }
  0x8a   : > { %v500_v29 = vpop.permute.xlu2 %499 }
  0x92   : > { %v1888_v35 = vpop.permute.xlu2 %505 }
  0xae   : > { %v466_v10 = vpop.f32.mrf.mxu0 }
  0xaf   : > { %v470_v11 = vadd.f32 %v466_v10, %v439_v9 }
  0xb1   : > { %1497 = vtanh.f32 %v470_v11  ;;  %v471_v15 = vmul.f32 0.5, %v470_v11 }
  0xb3   : > { %1499 = vtanh.f32 %v471_v15  ;;  %v1373_v15 = vld [vmem:[%s1848_s21 + $0x2] sm:$0x1] }
  0xb6   : > { %v468_v12 = vpop.f32.mrf.mxu0 }
  0xb7   : > { %v1498_v13 = vpop.eup %1497 }
  0xb8   : > { %482 = vrot.lane.b32.xlu0 %v1498_v13, %s1720_s9 }
  0xb9   : > { %v1500_v16 = vpop.eup %1499 }
  0xba   : > { %v473_v17 = vmul.f32 0.5, %v1500_v16  ;;  %v624_v16 = vunpack.c.l.bf16 %v1373_v15 }
  0xbc   : > { %v474_v18 = vadd.f32 0.5, %v473_v17  ;;  %v625_v17 = vadd.f32 %v1876_v8, %v624_v16 }
  0xc0   : > { %477 = vrot.lane.b32.xlu0 %v433_v14, %s1721_s13 }
 0x12a   : > { %v483_v19 = vpop.permute.xlu0 %482 }
 0x12b   : > { %v485_v20 = vmul.f32 %v483_v19, %v474_v18 }
 0x12d   : > { %487 = vrot.lane.b32.xlu1 %v485_v20, %s1721_s13 }
 0x132   : > { %v478_v21 = vpop.permute.xlu0 %477 }
 0x133   : > { %v480_v22 = vmul.f32 %v478_v21, %v474_v18 }
 0x19f   : > { %v488_v23 = vpop.permute.xlu1 %487 }
 0x1a0   : > { %v490_v24 = vadd.f32 %v488_v23, %v480_v22 }
 0x1a2   : > { %1501 = vtanh.f32 %v490_v24  ;;  %v516_v32 = vsub.f32 %v490_v24, %v478_v21 }
 0x1a8   : > { %v1502_v25 = vpop.eup %1501 }
 0x1a9   : > { %493 = vrot.lane.b32.xlu1 %v1502_v25, %s1720_s9 }
 0x21b   : > { %v494_v28 = vpop.permute.xlu1 %493 }
 0x21c   : > { %v496_v30 = vmul.f32 %v494_v28, %v474_v18  ;;  %v1375_v28 = vld [vmem:[%s1853_s24 + $0x4] sm:$0x3] }
 0x21e   : > { %v502_v31 = vsub.f32 %v496_v30, %v500_v29 }
 0x220   : > { %509 = vst [vmem:[#allocation1] ss:$4 sm:$0xff] %v502_v31 }
 0x227   : > { %v510_v33 = vld.sshfl [vmem:[#allocation1] sm:$0xff pattern:$0x73625140] }
 0x228   : > { %518 = vst [vmem:[#allocation1] ss:$4 sm:$0xff] %v516_v32  ;;  %511 = vrot.lane.b32.xlu0 %v510_v33, %s1721_s13 }
 0x22f   : > { %v519_v34 = vld.sshfl [vmem:[#allocation1] sm:$0xff pattern:$0x73625140] }
 0x230   : > { %526 = vst [vmem:[#allocation1] ss:$4 sm:$0xff] %v496_v30  ;;  %520 = vrot.lane.b32.xlu1 %v519_v34, %s1722_s19 }
 0x237   : > { %v1902_v2 = vld.sshfl [vmem:[#allocation1] sm:$0xff pattern:$0x73625140] }
 0x29a   : > { %v512_v36 = vpop.permute.xlu0 %511 }
 0x29b   : > { %v514_v37 = vmul.f32 %v512_v36, %v1888_v35 }
 0x29d   : > { %v515_v38 = vadd.f32 %v514_v37, %v1870_v4 }
 0x29f   : > { %v539_v39 = vpack.c.bf16 %v515_v38, %v515_v38 }
 0x2a1   : > { %1370 = vmatmul.msk.bf16.vlgmr.msra.gmra.mxu1 %vm453_vm1, %v539_v39 }
 0x2a2   : > { %v521_v40 = vpop.permute.xlu1 %520 }
 0x2a3   : > { %v523_v41 = vmul.f32 %v521_v40, %v1888_v35 }
 0x2a5   : > { %v524_v42 = vadd.f32 %v523_v41, %v433_v14 }
 0x2a7   : > { %563 = vrot.lane.b32.xlu0 %v524_v42, %s1721_s13 }
 0x2af   : > { %586 = vrot.lane.b32.xlu0 %v515_v38, %s1722_s19 }
 0x319   : > { %v564_v57 = vpop.permute.xlu0 %563 }
 0x31e   : > { %v552_v46 = vpop.f32.mrf.mxu1 }
 0x31f   : > { %v556_v47 = vadd.f32 %v552_v46, %v538_v45 }
 0x321   : > { %1503 = vtanh.f32 %v556_v47  ;;  %v557_v50 = vmul.f32 0.5, %v556_v47  ;;  %v587_v0 = vpop.permute.xlu0 %586 }
 0x323   : > { %1505 = vtanh.f32 %v557_v50 }
 0x326   : > { %v554_v48 = vpop.f32.mrf.mxu1 }
 0x327   : > { %v1504_v49 = vpop.eup %1503 }
 0x328   : > { %568 = vrot.lane.b32.xlu2 %v1504_v49, %s1720_s9 }
 0x329   : > { %v1506_v51 = vpop.eup %1505 }
 0x32a   : > { %v559_v52 = vmul.f32 0.5, %v1506_v51  ;;  %v1377_v51 = vld [vmem:[%s1848_s21 + $0x3] sm:$0x1] }
 0x32c   : > { %v560_v53 = vadd.f32 0.5, %v559_v52  ;;  %v711_v52 = vunpack.c.l.bf16 %v1377_v51 }
 0x32e   : > { %v566_v58 = vmul.f32 %v564_v57, %v560_v53 }
 0x382   : > { %v569_v54 = vpop.permute.xlu2 %568 }
 0x383   : > { %v571_v55 = vmul.f32 %v569_v54, %v560_v53 }
 0x385   : > { %573 = vrot.lane.b32.xlu1 %v571_v55, %s1721_s13 }
 0x38d   : > { %592 = vperm.xlu1 %1494, %v1371_v56  }
 0x3f7   : > { %v574_v59 = vpop.permute.xlu1 %573 }
 0x3f8   : > { %v576_v60 = vadd.f32 %v574_v59, %v566_v58 }
 0x3fa   : > { %1507 = vtanh.f32 %v576_v60  ;;  %v603_v3 = vsub.f32 %v576_v60, %v564_v57 }
 0x3ff   : > { %v1906_v6 = vpop.permute.xlu1 %592 }
 0x400   : > { %v1508_v61 = vpop.eup %1507 }
 0x401   : > { %579 = vrot.lane.b32.xlu2 %v1508_v61, %s1720_s9 }
 0x45b   : > { %v580_v62 = vpop.permute.xlu2 %579 }
 0x45c   : > { %v582_v63 = vmul.f32 %v580_v62, %v560_v53  ;;  %v712_v53 = vadd.f32 %v1876_v8, %v711_v52 }
 0x45e   : > { %v589_v1 = vsub.f32 %v582_v63, %v587_v0  ;;  %v1379_v0 = vld [vmem:[%s1853_s24 + $0x6] sm:$0x3] }
 0x460   : > { %596 = vst [vmem:[#allocation1] ss:$4 sm:$0xff] %v589_v1 }
 0x467   : > { %v597_v4 = vld.sshfl [vmem:[#allocation1] sm:$0xff pattern:$0x73625140] }
 0x468   : > { %605 = vst [vmem:[#allocation1] ss:$4 sm:$0xff] %v603_v3  ;;  %598 = vrot.lane.b32.xlu2 %v597_v4, %s1721_s13 }
 0x46f   : > { %v606_v5 = vld.sshfl [vmem:[#allocation1] sm:$0xff pattern:$0x73625140] }
 0x470   : > { %613 = vst [vmem:[#allocation1] ss:$4 sm:$0xff] %v582_v63  ;;  %607 = vrot.lane.b32.xlu0 %v606_v5, %s1722_s19 }
 0x477   : > { %v1919_v39 = vld.sshfl [vmem:[#allocation1] sm:$0xff pattern:$0x73625140] }
 0x4c2   : > { %v599_v7 = vpop.permute.xlu2 %598 }
 0x4c3   : > { %v601_v9 = vmul.f32 %v599_v7, %v1906_v6 }
 0x4c5   : > { %v602_v10 = vadd.f32 %v601_v9, %v515_v38 }
 0x4c7   : > { %v626_v11 = vpack.c.bf16 %v602_v10, %v602_v10 }
 0x4c9   : > { %1374 = vmatmul.msk.bf16.vlgmr.msra.gmra.mxu2 %vm453_vm1, %v626_v11 }
 0x4e2   : > { %v608_v12 = vpop.permute.xlu0 %607 }
 0x4e3   : > { %v610_v13 = vmul.f32 %v608_v12, %v1906_v6 }
 0x4e5   : > { %v611_v14 = vadd.f32 %v610_v13, %v524_v42 }
 0x4e7   : > { %650 = vrot.lane.b32.xlu2 %v611_v14, %s1721_s13 }
 0x4ef   : > { %673 = vrot.lane.b32.xlu2 %v602_v10, %s1722_s19 }
 0x541   : > { %v651_v29 = vpop.permute.xlu2 %650 }
 0x549   : > { %v674_v37 = vpop.permute.xlu2 %673 }
 0x54c   : > { %v639_v18 = vpop.f32.mrf.mxu2 }
 0x54d   : > { %v643_v19 = vadd.f32 %v639_v18, %v625_v17 }
 0x54f   : > { %1509 = vtanh.f32 %v643_v19  ;;  %v644_v22 = vmul.f32 0.5, %v643_v19 }
 0x551   : > { %1511 = vtanh.f32 %v644_v22 }
 0x554   : > { %v641_v20 = vpop.f32.mrf.mxu2 }
 0x555   : > { %v1510_v21 = vpop.eup %1509 }
 0x556   : > { %655 = vrot.lane.b32.xlu1 %v1510_v21, %s1720_s9 }
 0x557   : > { %v1512_v23 = vpop.eup %1511 }
 0x558   : > { %v646_v24 = vmul.f32 0.5, %v1512_v23 }
 0x55a   : > { %v647_v25 = vadd.f32 0.5, %v646_v24 }
 0x55c   : > { %v653_v30 = vmul.f32 %v651_v29, %v647_v25 }
 0x5c8   : > { %v656_v26 = vpop.permute.xlu1 %655 }
 0x5c9   : > { %v658_v27 = vmul.f32 %v656_v26, %v647_v25 }
 0x5cb   : > { %660 = vrot.lane.b32.xlu0 %v658_v27, %s1721_s13 }
 0x5d3   : > { %679 = vperm.xlu0 %1495, %v1375_v28  }
 0x63d   : > { %v661_v31 = vpop.permute.xlu0 %660 }
 0x63e   : > { %v663_v32 = vadd.f32 %v661_v31, %v653_v30 }
 0x640   : > { %1513 = vtanh.f32 %v663_v32  ;;  %v690_v40 = vsub.f32 %v663_v32, %v651_v29 }
 0x645   : > { %v1923_v43 = vpop.permute.xlu0 %679 }
 0x646   : > { %v1514_v33 = vpop.eup %1513 }
 0x647   : > { %666 = vrot.lane.b32.xlu1 %v1514_v33, %s1720_s9 }
 0x6b9   : > { %v667_v34 = vpop.permute.xlu1 %666 }
 0x6ba   : > { %v669_v36 = vmul.f32 %v667_v34, %v647_v25  ;;  %v1381_v25 = vld [vmem:[%s1848_s21 + $0x4] sm:$0x1] }
 0x6bb   : > { %v798_v26 = vunpack.c.l.bf16 %v1381_v25 }
 0x6bc   : > { %v676_v38 = vsub.f32 %v669_v36, %v674_v37 }
 0x6bd   : > { %v799_v27 = vadd.f32 %v1876_v8, %v798_v26 }
 0x6be   : > { %683 = vst [vmem:[#allocation1] ss:$4 sm:$0xff] %v676_v38 }
 0x6c5   : > { %v684_v41 = vld.sshfl [vmem:[#allocation1] sm:$0xff pattern:$0x73625140] }
 0x6c6   : > { %692 = vst [vmem:[#allocation1] ss:$4 sm:$0xff] %v690_v40  ;;  %685 = vrot.lane.b32.xlu1 %v684_v41, %s1721_s13  ;;  %v1383_v40 = vld [vmem:[%s1853_s24 + $0x8] sm:$0x3] }
 0x6cd   : > { %v693_v42 = vld.sshfl [vmem:[#allocation1] sm:$0xff pattern:$0x73625140] }
 0x6ce   : > { %700 = vst [vmem:[#allocation1] ss:$4 sm:$0xff] %v669_v36  ;;  %694 = vrot.lane.b32.xlu2 %v693_v42, %s1722_s19 }
 0x6d5   : > { %v1936_v13 = vld.sshfl [vmem:[#allocation1] sm:$0xff pattern:$0x73625140] }
 0x728   : > { %v695_v44 = vpop.permute.xlu2 %694 }
 0x729   : > { %v697_v45 = vmul.f32 %v695_v44, %v1923_v43 }
 0x72b   : > { %v698_v46 = vadd.f32 %v697_v45, %v611_v14 }
 0x72d   : > { %737 = vrot.lane.b32.xlu2 %v698_v46, %s1721_s13 }
 0x738   : > { %v686_v47 = vpop.permute.xlu1 %685 }
 0x739   : > { %v688_v48 = vmul.f32 %v686_v47, %v1923_v43 }
 0x73b   : > { %v689_v49 = vadd.f32 %v688_v48, %v602_v10 }
 0x73d   : > { %760 = vrot.lane.b32.xlu2 %v689_v49, %s1722_s19  ;;  %v713_v50 = vpack.c.bf16 %v689_v49, %v689_v49 }
 0x73f   : > { %1378 = vmatmul.msk.bf16.vlgmr.msra.gmra.mxu3 %vm453_vm1, %v713_v50 }
 0x787   : > { %v738_v1 = vpop.permute.xlu2 %737 }
 0x797   : > { %v761_v11 = vpop.permute.xlu2 %760 }
 0x7c2   : > { %v726_v54 = vpop.f32.mrf.mxu3 }
 0x7c3   : > { %v730_v55 = vadd.f32 %v726_v54, %v712_v53 }
 0x7c5   : > { %1515 = vtanh.f32 %v730_v55  ;;  %v731_v58 = vmul.f32 0.5, %v730_v55 }
 0x7c7   : > { %1517 = vtanh.f32 %v731_v58 }
 0x7ca   : > { %v728_v56 = vpop.f32.mrf.mxu3 }
 0x7cb   : > { %v1516_v57 = vpop.eup %1515 }
 0x7cc   : > { %742 = vrot.lane.b32.xlu1 %v1516_v57, %s1720_s9 }
 0x7cd   : > { %v1518_v59 = vpop.eup %1517 }
 0x7ce   : > { %v733_v60 = vmul.f32 0.5, %v1518_v59 }
 0x7d0   : > { %v734_v61 = vadd.f32 0.5, %v733_v60 }
 0x7d2   : > { %v740_v3 = vmul.f32 %v738_v1, %v734_v61 }
 0x83e   : > { %v743_v62 = vpop.permute.xlu1 %742 }
 0x83f   : > { %v745_v63 = vmul.f32 %v743_v62, %v734_v61 }
 0x841   : > { %747 = vrot.lane.b32.xlu0 %v745_v63, %s1721_s13  ;;  %v1385_v63 = vld [vmem:[%s1848_s21 + $0x5] sm:$0x1] }
 0x849   : > { %766 = vperm.xlu0 %1495, %v1379_v0   ;;  %v885_v0 = vunpack.c.l.bf16 %v1385_v63 }
 0x8b3   : > { %v748_v4 = vpop.permute.xlu0 %747 }
 0x8b4   : > { %v750_v5 = vadd.f32 %v748_v4, %v740_v3 }
 0x8b6   : > { %1519 = vtanh.f32 %v750_v5  ;;  %v777_v14 = vsub.f32 %v750_v5, %v738_v1  ;;  %v886_v1 = vadd.f32 %v1876_v8, %v885_v0 }
 0x8bb   : > { %v1940_v17 = vpop.permute.xlu0 %766 }
 0x8bc   : > { %v1520_v7 = vpop.eup %1519 }
 0x8bd   : > { %753 = vrot.lane.b32.xlu1 %v1520_v7, %s1720_s9 }
 0x92f   : > { %v754_v9 = vpop.permute.xlu1 %753 }
 0x930   : > { %v756_v10 = vmul.f32 %v754_v9, %v734_v61 }
 0x932   : > { %v763_v12 = vsub.f32 %v756_v10, %v761_v11 }
 0x934   : > { %770 = vst [vmem:[#allocation1] ss:$4 sm:$0xff] %v763_v12 }
 0x93b   : > { %v771_v15 = vld.sshfl [vmem:[#allocation1] sm:$0xff pattern:$0x73625140] }
 0x93c   : > { %772 = vrot.lane.b32.xlu1 %v771_v15, %s1721_s13  ;;  %779 = vst [vmem:[#allocation1] ss:$4 sm:$0xff] %v777_v14 }
 0x943   : > { %v780_v16 = vld.sshfl [vmem:[#allocation1] sm:$0xff pattern:$0x73625140] }
 0x944   : > { %781 = vrot.lane.b32.xlu2 %v780_v16, %s1722_s19  ;;  %787 = vst [vmem:[#allocation1] ss:$4 sm:$0xff] %v756_v10  ;;  %v1387_v16 = vld [vmem:[%s1853_s24 + $0xa] sm:$0x3] }
 0x94b   : > { %v1953_v51 = vld.sshfl [vmem:[#allocation1] sm:$0xff pattern:$0x73625140] }
 0x99e   : > { %v782_v18 = vpop.permute.xlu2 %781 }
 0x99f   : > { %v784_v19 = vmul.f32 %v782_v18, %v1940_v17 }
 0x9a1   : > { %v785_v20 = vadd.f32 %v784_v19, %v698_v46 }
 0x9a3   : > { %824 = vrot.lane.b32.xlu1 %v785_v20, %s1721_s13 }
 0x9ae   : > { %v773_v21 = vpop.permute.xlu1 %772 }
 0x9af   : > { %v775_v22 = vmul.f32 %v773_v21, %v1940_v17 }
 0x9b1   : > { %v776_v23 = vadd.f32 %v775_v22, %v689_v49 }
 0x9b3   : > { %v800_v24 = vpack.c.bf16 %v776_v23, %v776_v23  ;;  %847 = vrot.lane.b32.xlu1 %v776_v23, %s1722_s19 }
 0x9b5   : > { %1382 = vmatmul.msk.bf16.vlgmr.msrb.gmra.mxu0 %vm453_vm1, %v800_v24 }
 0xa15   : > { %v825_v41 = vpop.permute.xlu1 %824 }
 0xa25   : > { %v848_v49 = vpop.permute.xlu1 %847 }
 0xa32   : > { %v813_v28 = vpop.f32.mrf.mxu0 }
 0xa33   : > { %v817_v29 = vadd.f32 %v813_v28, %v799_v27 }
 0xa35   : > { %1521 = vtanh.f32 %v817_v29  ;;  %v818_v32 = vmul.f32 0.5, %v817_v29 }
 0xa37   : > { %1523 = vtanh.f32 %v818_v32 }
 0xa3a   : > { %v815_v30 = vpop.f32.mrf.mxu0 }
 0xa3b   : > { %v1522_v31 = vpop.eup %1521 }
 0xa3c   : > { %829 = vrot.lane.b32.xlu0 %v1522_v31, %s1720_s9 }
 0xa3d   : > { %v1524_v33 = vpop.eup %1523 }
 0xa3e   : > { %v820_v34 = vmul.f32 0.5, %v1524_v33 }
 0xa40   : > { %v821_v36 = vadd.f32 0.5, %v820_v34 }
 0xa42   : > { %v827_v42 = vmul.f32 %v825_v41, %v821_v36 }
 0xaae   : > { %v830_v37 = vpop.permute.xlu0 %829 }
 0xaaf   : > { %v832_v38 = vmul.f32 %v830_v37, %v821_v36 }
 0xab1   : > { %834 = vrot.lane.b32.xlu2 %v832_v38, %s1721_s13 }
 0xab9   : > { %853 = vperm.xlu2 %1493, %v1383_v40  }
 0xb0b   : > { %v835_v44 = vpop.permute.xlu2 %834 }
 0xb0c   : > { %v837_v45 = vadd.f32 %v835_v44, %v827_v42 }
 0xb0e   : > { %1525 = vtanh.f32 %v837_v45  ;;  %v864_v52 = vsub.f32 %v837_v45, %v825_v41  ;;  %v1389_v41 = vld [vmem:[%s1848_s21 + $0x6] sm:$0x1] }
 0xb0f   : > { %v972_v42 = vunpack.c.l.bf16 %v1389_v41 }
 0xb11   : > { %v973_v44 = vadd.f32 %v1876_v8, %v972_v42 }
 0xb13   : > { %v1957_v55 = vpop.permute.xlu2 %853 }
 0xb14   : > { %v1526_v46 = vpop.eup %1525 }
 0xb15   : > { %840 = vrot.lane.b32.xlu0 %v1526_v46, %s1720_s9 }
 0xb87   : > { %v841_v47 = vpop.permute.xlu0 %840 }
 0xb88   : > { %v843_v48 = vmul.f32 %v841_v47, %v821_v36 }
 0xb8a   : > { %v850_v50 = vsub.f32 %v843_v48, %v848_v49 }
 0xb8c   : > { %857 = vst [vmem:[#allocation1] ss:$4 sm:$0xff] %v850_v50 }
 0xb93   : > { %v858_v53 = vld.sshfl [vmem:[#allocation1] sm:$0xff pattern:$0x73625140] }
 0xb94   : > { %859 = vrot.lane.b32.xlu0 %v858_v53, %s1721_s13  ;;  %866 = vst [vmem:[#allocation1] ss:$4 sm:$0xff] %v864_v52 }
 0xb9b   : > { %v867_v54 = vld.sshfl [vmem:[#allocation1] sm:$0xff pattern:$0x73625140] }
 0xb9c   : > { %868 = vrot.lane.b32.xlu1 %v867_v54, %s1722_s19  ;;  %874 = vst [vmem:[#allocation1] ss:$4 sm:$0xff] %v843_v48 }
 0xba3   : > { %v1970_v27 = vld.sshfl [vmem:[#allocation1] sm:$0xff pattern:$0x73625140] }
 0xc06   : > { %v860_v56 = vpop.permute.xlu0 %859 }
 0xc07   : > { %v862_v57 = vmul.f32 %v860_v56, %v1957_v55 }
 0xc09   : > { %v863_v58 = vadd.f32 %v862_v57, %v776_v23  ;;  %v1391_v57 = vld [vmem:[%s1853_s24 + $0xc] sm:$0x3] }
 0xc0b   : > { %v887_v59 = vpack.c.bf16 %v863_v58, %v863_v58 }
 0xc0d   : > { %1386 = vmatmul.msk.bf16.vlgmr.msrb.gmra.mxu1 %vm453_vm1, %v887_v59 }
 0xc0e   : > { %v869_v60 = vpop.permute.xlu1 %868 }
 0xc0f   : > { %v871_v61 = vmul.f32 %v869_v60, %v1957_v55 }
 0xc11   : > { %v872_v62 = vadd.f32 %v871_v61, %v785_v20 }
 0xc13   : > { %911 = vrot.lane.b32.xlu0 %v872_v62, %s1721_s13 }
 0xc1b   : > { %934 = vrot.lane.b32.xlu0 %v863_v58, %s1722_s19 }
 0xc85   : > { %v912_v18 = vpop.permute.xlu0 %911 }
 0xc8a   : > { %v900_v3 = vpop.f32.mrf.mxu1 }
 0xc8b   : > { %v904_v4 = vadd.f32 %v900_v3, %v886_v1 }
 0xc8d   : > { %1527 = vtanh.f32 %v904_v4  ;;  %v905_v9 = vmul.f32 0.5, %v904_v4  ;;  %v935_v25 = vpop.permute.xlu0 %934 }
 0xc8f   : > { %1529 = vtanh.f32 %v905_v9 }
 0xc92   : > { %v902_v5 = vpop.f32.mrf.mxu1 }
 0xc93   : > { %v1528_v7 = vpop.eup %1527 }
 0xc94   : > { %916 = vrot.lane.b32.xlu2 %v1528_v7, %s1720_s9 }
 0xc95   : > { %v1530_v10 = vpop.eup %1529 }
 0xc96   : > { %v907_v11 = vmul.f32 0.5, %v1530_v10 }
 0xc98   : > { %v908_v12 = vadd.f32 0.5, %v907_v11 }
 0xc9a   : > { %v914_v19 = vmul.f32 %v912_v18, %v908_v12 }
 0xcee   : > { %v917_v14 = vpop.permute.xlu2 %916 }
 0xcef   : > { %v919_v15 = vmul.f32 %v917_v14, %v908_v12 }
 0xcf1   : > { %921 = vrot.lane.b32.xlu1 %v919_v15, %s1721_s13 }
 0xcf9   : > { %940 = vperm.xlu1 %1494, %v1387_v16  }
 0xd63   : > { %v922_v20 = vpop.permute.xlu1 %921 }
 0xd64   : > { %v924_v21 = vadd.f32 %v922_v20, %v914_v19 }
 0xd66   : > { %1531 = vtanh.f32 %v924_v21  ;;  %v951_v28 = vsub.f32 %v924_v21, %v912_v18 }
 0xd6b   : > { %v1974_v31 = vpop.permute.xlu1 %940 }
 0xd6c   : > { %v1532_v22 = vpop.eup %1531 }
 0xd6d   : > { %927 = vrot.lane.b32.xlu2 %v1532_v22, %s1720_s9 }
 0xdc7   : > { %v928_v23 = vpop.permute.xlu2 %927 }
 0xdc8   : > { %v930_v24 = vmul.f32 %v928_v23, %v908_v12 }
 0xdca   : > { %v937_v26 = vsub.f32 %v930_v24, %v935_v25  ;;  %v1393_v25 = vld [vmem:[%s1848_s21 + $0x7] sm:$0x1]  ;;  %s1148_s21 = scalar_lea.sflag [#allocation4], %s2127_s20 }
 0xdcc   : > { %944 = vst [vmem:[#allocation1] ss:$4 sm:$0xff] %v937_v26 }
 0xdd3   : > { %v945_v29 = vld.sshfl [vmem:[#allocation1] sm:$0xff pattern:$0x73625140] }
 0xdd4   : > { %946 = vrot.lane.b32.xlu2 %v945_v29, %s1721_s13  ;;  %953 = vst [vmem:[#allocation1] ss:$4 sm:$0xff] %v951_v28  ;;  %v1059_v28 = vunpack.c.l.bf16 %v1393_v25 }
 0xddb   : > { %v954_v30 = vld.sshfl [vmem:[#allocation1] sm:$0xff pattern:$0x73625140] }
 0xddc   : > { %955 = vrot.lane.b32.xlu0 %v954_v30, %s1722_s19  ;;  %961 = vst [vmem:[#allocation1] ss:$4 sm:$0xff] %v930_v24 }
 0xde3   : > { %v1987_v4 = vld.sshfl [vmem:[#allocation1] sm:$0xff pattern:$0x73625140] }
 0xe2e   : > { %v947_v32 = vpop.permute.xlu2 %946 }
 0xe2f   : > { %v949_v33 = vmul.f32 %v947_v32, %v1974_v31 }
 0xe31   : > { %v950_v34 = vadd.f32 %v949_v33, %v863_v58 }
 0xe33   : > { %v974_v36 = vpack.c.bf16 %v950_v34, %v950_v34 }
 0xe35   : > { %1390 = vmatmul.msk.bf16.vlgmr.msrb.gmra.mxu2 %vm453_vm1, %v974_v36 }
 0xe4e   : > { %v956_v37 = vpop.permute.xlu0 %955 }
 0xe4f   : > { %v958_v38 = vmul.f32 %v956_v37, %v1974_v31 }
 0xe51   : > { %v959_v40 = vadd.f32 %v958_v38, %v872_v62 }
 0xe53   : > { %998 = vrot.lane.b32.xlu2 %v959_v40, %s1721_s13 }
 0xe5b   : > { %1021 = vrot.lane.b32.xlu2 %v950_v34, %s1722_s19 }
 0xead   : > { %v999_v58 = vpop.permute.xlu2 %998 }
 0xeb5   : > { %v1022_v1 = vpop.permute.xlu2 %1021 }
 0xeb8   : > { %v987_v45 = vpop.f32.mrf.mxu2 }
 0xeb9   : > { %v991_v46 = vadd.f32 %v987_v45, %v973_v44  ;;  %v1395_v45 = vld [vmem:[%s1853_s24 + $0xe] sm:$0x3]  ;;  %s1191_s24 = sshll.u32 %s1725_s23, 4  ;;  %s1192_s24 = int_to_ptr.vmem [resolvable:$true] %s1191_s24 }
 0xebb   : > { %1533 = vtanh.f32 %v991_v46  ;;  %v992_v49 = vmul.f32 0.5, %v991_v46 }
 0xebd   : > { %1535 = vtanh.f32 %v992_v49 }
 0xec0   : > { %v989_v47 = vpop.f32.mrf.mxu2 }
 0xec1   : > { %v1534_v48 = vpop.eup %1533 }
 0xec2   : > { %1003 = vrot.lane.b32.xlu1 %v1534_v48, %s1720_s9 }
 0xec3   : > { %v1536_v50 = vpop.eup %1535 }
 0xec4   : > { %v994_v52 = vmul.f32 0.5, %v1536_v50 }
 0xec6   : > { %v995_v53 = vadd.f32 0.5, %v994_v52 }
 0xec8   : > { %v1001_v59 = vmul.f32 %v999_v58, %v995_v53 }
 0xf34   : > { %v1004_v54 = vpop.permute.xlu1 %1003 }
 0xf35   : > { %v1006_v56 = vmul.f32 %v1004_v54, %v995_v53 }
 0xf37   : > { %1008 = vrot.lane.b32.xlu0 %v1006_v56, %s1721_s13 }
 0xf3f   : > { %1027 = vperm.xlu0 %1495, %v1391_v57  }
 0xfa9   : > { %v1009_v60 = vpop.permute.xlu0 %1008 }
 0xfaa   : > { %v1011_v61 = vadd.f32 %v1009_v60, %v1001_v59 }
 0xfac   : > { %1537 = vtanh.f32 %v1011_v61  ;;  %v1038_v5 = vsub.f32 %v1011_v61, %v999_v58 }
 0xfb1   : > { %v1028_v10 = vpop.permute.xlu0 %1027 }
 0xfb2   : > { %v1538_v62 = vpop.eup %1537 }
 0xfb3   : > { %1014 = vrot.lane.b32.xlu1 %v1538_v62, %s1720_s9 }
0x1025   : > { %v1015_v63 = vpop.permute.xlu1 %1014 }
0x1026   : > { %v1017_v0 = vmul.f32 %v1015_v63, %v995_v53 }
0x1028   : > { %v1024_v3 = vsub.f32 %v1017_v0, %v1022_v1 }
0x102a   : > { %1031 = vst [vmem:[#allocation1] ss:$4 sm:$0xff] %v1024_v3 }
0x1031   : > { %v1032_v7 = vld.sshfl [vmem:[#allocation1] sm:$0xff pattern:$0x73625140] }
0x1032   : > { %1033 = vrot.lane.b32.xlu1 %v1032_v7, %s1721_s13  ;;  %1040 = vst [vmem:[#allocation1] ss:$4 sm:$0xff] %v1038_v5 }
0x1039   : > { %v1041_v9 = vld.sshfl [vmem:[#allocation1] sm:$0xff pattern:$0x73625140] }
0x103a   : > { %1042 = vrot.lane.b32.xlu2 %v1041_v9, %s1722_s19  ;;  %1048 = vst [vmem:[#allocation1] ss:$4 sm:$0xff] %v1017_v0 }
0x1041   : > { %v1049_v20 = vld.sshfl [vmem:[#allocation1] sm:$0xff pattern:$0x73625140] }
0x1094   : > { %v1043_v11 = vpop.permute.xlu2 %1042 }
0x1095   : > { %v1045_v12 = vmul.f32 %v1043_v11, %v1028_v10 }
0x1097   : > { %v1991_v14 = vadd.f32 %v1045_v12, %v959_v40 }
0x1099   : > { %1085 = vrot.lane.b32.xlu1 %v1991_v14, %s1721_s13 }
0x10a4   : > { %v1034_v15 = vpop.permute.xlu1 %1033 }
0x10a5   : > { %v1036_v16 = vmul.f32 %v1034_v15, %v1028_v10 }
0x10a7   : > { %v1995_v18 = vadd.f32 %v1036_v16, %v950_v34 }
0x10a9   : > { %v1061_v19 = vpack.c.bf16 %v1995_v18, %v1995_v18  ;;  %1108 = vrot.lane.b32.xlu1 %v1995_v18, %s1722_s19 }
0x10ab   : > { %1394 = vmatmul.msk.bf16.vlgmr.msrb.gmra.mxu3 %vm453_vm1, %v1061_v19 }
0x10b1   : > { %528 = vrot.lane.b32.xlu1 %v1902_v2, %s1721_s13 }
0x10b9   : > { %789 = vrot.lane.b32.xlu1 %v1953_v51, %s1721_s13  ;;  %v1060_v51 = vadd.f32 %v1876_v8, %v1059_v28 }
0x10c1   : > { %1050 = vrot.lane.b32.xlu1 %v1049_v20, %s1721_s13 }
0x110b   : > { %v2007_v21 = vpop.permute.xlu1 %1085 }
0x111b   : > { %v1109_v22 = vpop.permute.xlu1 %1108 }
0x1123   : > { %v529_v23 = vpop.permute.xlu1 %528 }
0x1124   : > { %v531_v24 = vmul.f32 %v529_v23, %v1888_v35 }
0x1126   : > { %v532_v26 = vpack.c.bf16 %v531_v24, %v531_v24 }
0x1128   : > { %534 = vst.msk [vmem:[%s1855_s2] sm:$0x1] %vm533_vm2, %v532_v26 }
0x112b   : > { %v790_v2 = vpop.permute.xlu1 %789 }
0x112c   : > { %v792_v29 = vmul.f32 %v790_v2, %v1940_v17 }
0x112e   : > { %v793_v30 = vpack.c.bf16 %v792_v29, %v792_v29  ;;  %v1074_v32 = vpop.f32.mrf.mxu3 }
0x112f   : > { %v1078_v33 = vadd.f32 %v1074_v32, %v1060_v51 }
0x1130   : > { %1380 = vst.msk [vmem:[%s1855_s2 + $0x3] sm:$0x1] %vm533_vm2, %v793_v30 }
0x1131   : > { %1539 = vtanh.f32 %v1078_v33  ;;  %v1079_v40 = vmul.f32 0.5, %v1078_v33 }
0x1133   : > { %v1051_v35 = vpop.permute.xlu1 %1050  ;;  %1541 = vtanh.f32 %v1079_v40 }
0x1134   : > { %v1053_v34 = vmul.f32 %v1051_v35, %v1028_v10 }
0x1136   : > { %v1054_v36 = vpack.c.bf16 %v1053_v34, %v1053_v34  ;;  %v1076_v37 = vpop.f32.mrf.mxu3 }
0x1137   : > { %v1540_v38 = vpop.eup %1539 }
0x1138   : > { %1392 = vst.msk [vmem:[%s1855_s2 + $0x6] sm:$0x1] %vm533_vm2, %v1054_v36  ;;  %1090 = vrot.lane.b32.xlu0 %v1540_v38, %s1720_s9 }
0x1139   : > { %v1542_v8 = vpop.eup %1541 }
0x113a   : > { %v1081_v17 = vmul.f32 0.5, %v1542_v8 }
0x113c   : > { %v1082_v41 = vadd.f32 0.5, %v1081_v17 }
0x113e   : > { %v1088_v46 = vmul.f32 %v2007_v21, %v1082_v41 }
0x11aa   : > { %v1091_v42 = vpop.permute.xlu0 %1090 }
0x11ab   : > { %v1093_v44 = vmul.f32 %v1091_v42, %v1082_v41 }
0x11ad   : > { %1095 = vrot.lane.b32.xlu2 %v1093_v44, %s1721_s13 }
0x11b5   : > { %1114 = vperm.xlu2 %1493, %v1395_v45  }
0x11bd   : > { %615 = vrot.lane.b32.xlu2 %v1919_v39, %s1721_s13 }
0x11c5   : > { %876 = vrot.lane.b32.xlu2 %v1970_v27, %s1721_s13 }
0x1207   : > { %v1096_v47 = vpop.permute.xlu2 %1095 }
0x1208   : > { %v1098_v48 = vadd.f32 %v1096_v47, %v1088_v46 }
0x120a   : > { %1543 = vtanh.f32 %v1098_v48  ;;  %v1125_v61 = vsub.f32 %v1098_v48, %v2007_v21 }
0x120f   : > { %v1115_v49 = vpop.permute.xlu2 %1114 }
0x1210   : > { %v1544_v50 = vpop.eup %1543 }
0x1211   : > { %1101 = vrot.lane.b32.xlu0 %v1544_v50, %s1720_s9 }
0x1217   : > { %v616_v52 = vpop.permute.xlu2 %615 }
0x1218   : > { %v618_v53 = vmul.f32 %v616_v52, %v1906_v6 }
0x1219   : > { %702 = vrot.lane.b32.xlu0 %v1936_v13, %s1721_s13 }
0x121a   : > { %v619_v39 = vpack.c.bf16 %v618_v53, %v618_v53 }
0x121c   : > { %1372 = vst.msk [vmem:[%s1855_s2 + $0x1] sm:$0x1] %vm533_vm2, %v619_v39 }
0x121f   : > { %v877_v27 = vpop.permute.xlu2 %876 }
0x1220   : > { %v879_v54 = vmul.f32 %v877_v27, %v1957_v55 }
0x1221   : > { %963 = vrot.lane.b32.xlu0 %v1987_v4, %s1721_s13 }
0x1222   : > { %v880_v56 = vpack.c.bf16 %v879_v54, %v879_v54 }
0x1224   : > { %1384 = vst.msk [vmem:[%s1855_s2 + $0x4] sm:$0x1] %vm533_vm2, %v880_v56 }
0x1283   : > { %v1102_v57 = vpop.permute.xlu0 %1101 }
0x1284   : > { %v1104_v58 = vmul.f32 %v1102_v57, %v1082_v41 }
0x1286   : > { %v1111_v6 = vsub.f32 %v1104_v58, %v1109_v22 }
0x1288   : > { %1118 = vst [vmem:[#allocation1] ss:$4 sm:$0xff] %v1111_v6 }
0x128b   : > { %v703_v59 = vpop.permute.xlu0 %702 }
0x128c   : > { %v705_v13 = vmul.f32 %v703_v59, %v1923_v43 }
0x128e   : > { %v706_v60 = vpack.c.bf16 %v705_v13, %v705_v13 }
0x128f   : > { %v1119_v62 = vld.sshfl [vmem:[#allocation1] sm:$0xff pattern:$0x73625140] }
0x1290   : > { %1376 = vst.msk [vmem:[%s1855_s2 + $0x2] sm:$0x1] %vm533_vm2, %v706_v60  ;;  %1120 = vrot.lane.b32.xlu0 %v1119_v62, %s1721_s13 }
0x1291   : > { %1127 = vst [vmem:[#allocation1] ss:$4 sm:$0xff] %v1125_v61 }
0x1293   : > { %v964_v55 = vpop.permute.xlu0 %963 }
0x1294   : > { %v966_v63 = vmul.f32 %v964_v55, %v1974_v31 }
0x1296   : > { %v967_v0 = vpack.c.bf16 %v966_v63, %v966_v63 }
0x1298   : > { %1388 = vst.msk [vmem:[%s1855_s2 + $0x5] sm:$0x1] %vm533_vm2, %v967_v0  ;;  %v1128_v1 = vld.sshfl [vmem:[#allocation1] sm:$0xff pattern:$0x73625140] }
0x1299   : > { %1129 = vrot.lane.b32.xlu2 %v1128_v1, %s1722_s19  ;;  %1135 = vst [vmem:[#allocation1] ss:$4 sm:$0xff] %v1104_v58  ;;  %s1160_s19 = sshll.u32 %s1855_s2, 4  ;;  %s1161_s19 = int_to_ptr.vmem [resolvable:$true] %s1160_s19 }
0x12a0   : > { %v1136_v43 = vld.sshfl [vmem:[#allocation1] sm:$0xff pattern:$0x73625140] }
0x12a1   : > { %1137 = vrot.lane.b32.xlu0 %v1136_v43, %s1721_s13  ;;  %s1159_s13 = scalar_lea.hbm %s2113_s6, %s1839_s26 }
0x12a2   : > { %s1162_s25 = sshll.u32 %s1159_s13, 4  ;;  %s1163_s25 = int_to_ptr.hbm [resolvable:$true] %s1162_s25 }
0x12a3   : > { %s1645_s23 = sshra.s32 %s1163_s25, 4  ;;  %s1646_s23 = int_to_ptr.hbm [resolvable:$true] %s1645_s23 }
0x12a4   : > { %p1652_p7 = scmp.lt.s32.totalorder %s1646_s23, %s2113_s6 }
0x12f3   : > { %v1130_v3 = vpop.permute.xlu2 %1129 }
0x12f4   : > { %v1132_v4 = vmul.f32 %v1130_v3, %v1115_v49 }
0x12f6   : > { %v1133_v5 = vadd.f32 %v1132_v4, %v1991_v14 }
0x12f8   : > { %1146 = vst.msk [vmem:[#allocation8] sm:$0x3] %vm1144_vm3, %v1133_v5 }
0x1302   : > { %v1121_v31 = vpop.permute.xlu0 %1120 }
0x1303   : > { %v1123_v7 = vmul.f32 %v1121_v31, %v1115_v49 }
0x1305   : > { %v1124_v9 = vadd.f32 %v1123_v7, %v1995_v18 }
0x1307   : > { %1145 = vst.msk [vmem:[#allocation6] sm:$0x3] %vm1144_vm3, %v1124_v9 }
0x1308   : > { %1413 = dma.vmem_to_hbm [thread:$0]  (%p1809_p2), %s1178_s17, 32, %s1180_s22, [#allocation7]  }
0x1309   : > { %1415 = dma.vmem_to_hbm [thread:$0]  (%p1809_p2), %s1192_s24, 32, %s1194_s11, [#allocation7]  }
0x130a   : > { %s1647_s17 = scalar_lea.hbm %s1646_s23, 8  ;;  %s1651_s24 = scalar_lea.hbm %s2113_s6, 16 }
0x130b   : > { %p1648_p3 = scmp.ne.s32.totalorder %s1646_s23, %s1647_s17  ;;  %p1653_p9 = scmp.lt.s32.totalorder %s1651_s24, %s1647_s17 }
0x130d   : > { %p1649_p5 = pnand %p1648_p3, %p1819_p4  ;;  %p1654_p10 = por %p1653_p9, %p1652_p7 }
0x130f   : > { %p1650_p6 = pneg %p1649_p5 }
0x1311   : > { %p1655_p11 = pnand %p1654_p10, %p1650_p6 }
0x1313   : > { %v1138_v10 = vpop.permute.xlu0 %1137 }
0x1314   : > { %v1140_v11 = vmul.f32 %v1138_v10, %v1115_v49 }
0x1316   : > { %v1141_v12 = vpack.c.bf16 %v1140_v11, %v1140_v11 }
0x1318   : > { %1396 = vst.msk [vmem:[%s1855_s2 + $0x7] sm:$0x1] %vm533_vm2, %v1141_v12 }
0x1319   : > { %1658 = shalt.err (!%p1655_p11)
}
0x131a   : > { %s1726_s2 = smov 16   ;;  %s1727_s11 = smov 1  }
0x131b   : > { %1411 = dma.vmem_to_hbm [thread:$0]  (%p1819_p4), %s1161_s19, 128, %s1163_s25, %s1148_s21, %s1726_s2, %s1726_s2, %s1727_s11  }
0x131c   : > { %1688 = dma.done.wait (%p1809_p2), [#allocation7], 64  }
0x131d   : > { %1690 = vsyncadd (%p1809_p2), [#allocation7], 4294967232 }
0x131e PF: > { %p1435_p12 = scmp.ge.s32.totalorder %s1717_s10, 2  ;;  %s1215_s30 = sand.u32 1, %s1697_s27  }
0x131f   : > { %s1216_s9 = scalar_lea.sflag [#allocation4], %s1215_s30 }
0x1320   : > { %p1426_p13 = pnand %p1435_p12, %p1826_p8 }
0x1322   : > { %p1427_p0 = pneg %p1426_p13 }
0x1324   : > { %1692 = dma.done.wait (%p1427_p0), %s1216_s9, 128  }
0x1325   : > { %1694 = vsyncadd (%p1427_p0), %s1216_s9, 4294967168  ;;  %s24_s10 = sadd.s32 1, %s1717_s10   ;;  %s2128_s16 = sld [smem:[#allocation14_spill]] }
0x1326   : > { %p21_p4 = scmp.ge.s32.totalorder %s24_s10, 4   ;;  %s2129_s30 = sld [smem:[#allocation12_spill]] }
0x1327   : > { %s2130_s9 = sld [smem:[#allocation13_spill]]  ;;  %s2131_s27 = smov %s1701_s28 }
0x1328   : > { %s2132_s28 = smov %s1705_s29  ;;  %23 = sbr.rel (!%p21_p4) target bundleno = 8 (0x8), region = 136 }
0x132b   : > { %s2133_s29 = smov %s2128_s16 }
0x132d   :  { %1222 = vsyncpa [#allocation3], 1 }
0x132e   :  { %1224 = vsyncpa [#allocation3 + $0x1], 1 }
0x132f   :  { %1225 = vsyncpa [#allocation4], 1 }
0x1330   :  { %1227 = vsyncpa [#allocation4 + $0x1], 1 }
0x1331   :  { %1228 = vsyncpa [#allocation7], 1 }

</bundles_post_ra>
